<compile_context>
chip_gen: v7x
topology: tpu7x:2x2x1
jax: 0.10.0
libtpu: 0.0.40
codegen_flags: <defaults>
</compile_context>

<pallas_src>
import math

import jax
import jax.numpy as jnp
import numpy as np
from jax.experimental import pallas as pl
from jax.experimental.pallas import tpu as pltpu


def _hgnn_att_fused_kernel(x0_ref, b_ref, bt_ref, hgc_b_ref, fc1_wt_ref,
                           fus_w1t_ref, fus_b1_ref, fus_w2_ref, fus_b2_ref,
                           x_out_ref, edge_out_ref, x_carry):
    step = pl.program_id(0)

    # Initialize the carried node embedding from the kernel input on step 0.
    @pl.when(step == 0)
    def _():
        x_carry[...] = x0_ref[...]

    nu = b_ref.shape[0]              # n_users (static)
    x = x_carry[...]                 # (N, D) f32 current node embeddings

    # --- HGNN2.forward: relu -> HGNN_conv(hgc1) -> softmax(dim=1) -> fc1 ---
    xb = jnp.maximum(x, 0.0) + hgc_b_ref[...]         # relu(x) + hgc1.bias (f32)
    xb_bf = xb.astype(jnp.bfloat16)                   # bf16 MXU operand, f32 acc
    b = b_ref[...]                                    # (nu, ni) bf16
    bt = bt_ref[...]                                  # (ni, nu) bf16

    # G = [[0, B], [B^T, 0]] is symmetric (D^-1/2 A D^-1/2 with symmetric A),
    # so edge = G.T @ xb == G @ xb; block-wise:
    edge_u = jnp.dot(b, xb_bf[nu:], preferred_element_type=jnp.float32)   # (nu, D)
    edge_i = jnp.dot(bt, xb_bf[:nu], preferred_element_type=jnp.float32)  # (ni, D)
    edge_out_ref[:nu, :] = edge_u
    edge_out_ref[nu:, :] = edge_i

    # h = G @ edge, block-wise (halves cross: h_u <- edge_i, h_i <- edge_u).
    h_u = jnp.dot(b, edge_i.astype(jnp.bfloat16), preferred_element_type=jnp.float32)
    h_i = jnp.dot(bt, edge_u.astype(jnp.bfloat16), preferred_element_type=jnp.float32)

    fc1_wt = fc1_wt_ref[...]          # (D, D) bf16
    w1t = fus_w1t_ref[...]            # (D, D) bf16
    b1 = fus_b1_ref[...]              # (1, D) f32
    w2 = fus_w2_ref[...]              # (1, D) f32
    b2 = fus_b2_ref[0, 0]             # scalar (SMEM)

    def half_update(x_h, h_h):
        # softmax over the feature dim (torch dim=1) -- XLU lane reduce.
        h_max = jnp.max(h_h, axis=1, keepdims=True)
        h_exp = jnp.exp(h_h - h_max)
        h_soft = h_exp * pl.reciprocal(jnp.sum(h_exp, axis=1, keepdims=True),
                                       approx=True)
        # fc1 (bias=False); F.dropout on node: identity in eval mode.
        node = jnp.dot(h_soft.astype(jnp.bfloat16), fc1_wt,
                       preferred_element_type=jnp.float32)
        # Fusion(hidden=x_h, dy_emb=node) without stacking a (2N, D) slab.
        t_x = jnp.tanh(jnp.dot(x_h.astype(jnp.bfloat16), w1t,
                               preferred_element_type=jnp.float32) + b1)
        t_n = jnp.tanh(jnp.dot(node.astype(jnp.bfloat16), w1t,
                               preferred_element_type=jnp.float32) + b1)
        # linear2 (D -> 1): lane-dense VPU/XLU reduce instead of a (D,1) matmul.
        s_x = jnp.sum(t_x * w2, axis=-1, keepdims=True) + b2
        s_n = jnp.sum(t_n * w2, axis=-1, keepdims=True) + b2
        m = jnp.maximum(s_x, s_n)
        e_x = jnp.exp(s_x - m)
        e_n = jnp.exp(s_n - m)
        inv = pl.reciprocal(e_x + e_n, approx=True)
        # Fusion dropout on the scores: identity in eval mode.
        return (e_x * inv) * x_h + (e_n * inv) * node

    x_new_u = half_update(x[:nu], h_u)
    x_new_i = half_update(x[nu:], h_i)

    # Feed the next sub-graph iteration and emit this step's node embedding.
    x_carry[:nu, :] = x_new_u
    x_carry[nu:, :] = x_new_i
    x_out_ref[:nu, :] = x_new_u
    x_out_ref[nu:, :] = x_new_i


def hgnn_att_fused(x, b_stack, bt_stack, params):
    """Run all S sub-graph iterations in ONE pallas_call; returns stacked
    (S, N, D) node embeddings and (S, N, D) edge embeddings."""
    S, NU, NI = b_stack.shape
    N, D = x.shape
    assert NU + NI == N
    hgc_b, fc1_wt, fus_w1t, fus_b1, fus_w2, fus_b2 = params

    # Advisory cost estimate (lets XLA schedule surrounding ops around the call).
    flops = S * (8 * NU * NI * D + 6 * N * D * D)
    transc = S * (3 * N * D + 4 * N)
    bytes_acc = (S * (2 * 2 * NU * NI + 2 * N * D * 4)   # bf16 B/B^T stream + f32 outs
                 + N * D * 4 + 2 * D * D * 2 + 4 * D * 4)  # x0 + resident params

    out_shape = (jax.ShapeDtypeStruct((S, N, D), jnp.float32),
                 jax.ShapeDtypeStruct((S, N, D), jnp.float32))

    return pl.pallas_call(
        _hgnn_att_fused_kernel,
        out_shape=out_shape,
        grid=(S,),
        in_specs=[
            # x0: resident (constant block index -> single DMA).
            pl.BlockSpec((N, D), lambda s: (0, 0)),
            # Bipartite adjacency blocks, streamed per sub-graph (bf16).
            pl.BlockSpec((None, NU, NI), lambda s: (s, 0, 0)),
            pl.BlockSpec((None, NI, NU), lambda s: (s, 0, 0)),
            # Parameters: resident in VMEM across all grid steps.
            pl.BlockSpec((1, D), lambda s: (0, 0)),     # hgc1.bias (f32)
            pl.BlockSpec((D, D), lambda s: (0, 0)),     # fc1.W^T (bf16)
            pl.BlockSpec((D, D), lambda s: (0, 0)),     # fus.linear1.W^T (bf16)
            pl.BlockSpec((1, D), lambda s: (0, 0)),     # fus.linear1.bias (f32)
            pl.BlockSpec((1, D), lambda s: (0, 0)),     # fus.linear2.W row (f32)
            # (1,1) scalar bias -> SMEM, no VMEM tile / DMA double-buffer.
            pl.BlockSpec(memory_space=pltpu.MemorySpace.SMEM),
        ],
        out_specs=(pl.BlockSpec((None, N, D), lambda s: (s, 0, 0)),
                   pl.BlockSpec((None, N, D), lambda s: (s, 0, 0))),
        scratch_shapes=[pltpu.VMEM((N, D), jnp.float32)],   # carried x
        compiler_params=pltpu.CompilerParams(
            # sequential carry across sub-graphs => this axis is NOT parallel.
            dimension_semantics=("arbitrary",),
            # Safe on v5e/v6e/v7x; raises v5e's 16 MiB scoped default.
            vmem_limit_bytes=32 * 1024 * 1024),
        cost_estimate=pl.CostEstimate(flops=flops, transcendentals=transc,
                                      bytes_accessed=bytes_acc),
    )(x, b_stack, bt_stack, hgc_b, fc1_wt, fus_w1t, fus_b1, fus_w2, fus_b2)
    # TODO(synk): v7x dual-TC row-split of B/B^T (core_map + VMEM_SHARED exchange
    # of edge between the two G matmuls) not implemented; single-TC sequential S.


def get_norm_bipartite_block(inter):
    """User-item block B of G = D^-1/2 A D^-1/2 = [[0, B], [B^T, 0]], matching
    get_norm_adj_mat (binary A, degree + 1e-7).  Host-side glue, not hot path."""
    a = (inter != 0).astype(jnp.float32)
    deg_u = jnp.sum(a, axis=1) + 1e-7
    deg_i = jnp.sum(a, axis=0) + 1e-7
    return (deg_u[:, None] ** -0.5) * a * (deg_i[None, :] ** -0.5)


def get_norm_adj_mat_dense(inter):
    """Dense f32 G for the pure-JAX reference only."""
    n_users, n_items = inter.shape
    n = n_users + n_items
    a_bin = (inter != 0).astype(jnp.float32)
    A = jnp.zeros((n, n), jnp.float32)
    A = A.at[:n_users, n_users:].set(a_bin)
    A = A.at[n_users:, :n_users].set(a_bin.T)
    deg = jnp.sum((A > 0).astype(jnp.float32), axis=1) + 1e-7
    dinv = jnp.power(deg, -0.5)
    return dinv[:, None] * A * dinv[None, :]


def init_params(key, D):
    """Deterministic synthetic parameters matching the module's __init__ shapes
    (torch layout)."""
    ks = jax.random.split(key, 6)
    stdv = 1.0 / math.sqrt(D)
    # hgc1.bias ~ U(-stdv, stdv); hgc1.weight / weight1 are never used in forward.
    hgc_b = jax.random.uniform(ks[0], (1, D), jnp.float32, -stdv, stdv)
    # HGNN2.fc1 (Linear D->D, bias=False), torch weight layout (out, in).
    fc1_w = jax.random.uniform(ks[1], (D, D), jnp.float32, -stdv, stdv)
    # Fusion.linear1: xavier_normal weight (D,D), default bias (D,).
    xav1 = math.sqrt(2.0 / (D + D))
    fus_w1 = jax.random.normal(ks[2], (D, D), jnp.float32) * xav1
    fus_b1 = jax.random.uniform(ks[3], (1, D), jnp.float32, -stdv, stdv)
    # Fusion.linear2: xavier_normal weight (1,D), bias (1,).
    xav2 = math.sqrt(2.0 / (D + 1))
    fus_w2 = jax.random.normal(ks[4], (1, D), jnp.float32) * xav2
    fus_b2 = jax.random.uniform(ks[5], (1, 1), jnp.float32, -stdv, stdv)
    return hgc_b, fc1_w, fus_w1, fus_b1, fus_w2, fus_b2


def prepare_params(params):
    """Host-side one-time layout prep: pre-transpose the (out,in) torch weights
    (plain A @ B in-kernel) and store the big matmul weights in bf16."""
    hgc_b, fc1_w, fus_w1, fus_b1, fus_w2, fus_b2 = params
    return (hgc_b,
            fc1_w.T.astype(jnp.bfloat16),
            fus_w1.T.astype(jnp.bfloat16),
            fus_b1, fus_w2, fus_b2)


def hgnn_att_forward(x, hypergraph_dict, root_indices, params):
    """JAX equivalent of HGNN_ATT.forward (eval mode)."""
    # root_emb = F.embedding(hypergraph_list[1], x)  -- plain gather; unused downstream.
    root_emb = jnp.take(x, root_indices, axis=0)
    del root_emb
    keys = list(hypergraph_dict.keys())
    # Build + stack only the bipartite blocks once (bf16 stream into the kernel).
    b_list = [get_norm_bipartite_block(hypergraph_dict[k]) for k in keys]
    b_stack = jnp.stack(b_list).astype(jnp.bfloat16)
    bt_stack = jnp.stack([b.T for b in b_list]).astype(jnp.bfloat16)
    x_all, edge_all = hgnn_att_fused(x, b_stack, bt_stack, prepare_params(params))
    return {k: (x_all[i], edge_all[i]) for i, k in enumerate(keys)}


def hgnn_att_reference(x, hypergraph_dict, params):
    """Pure-JAX f32 reference mirroring the torch math literally (validation)."""
    hgc_b, fc1_w, fus_w1, fus_b1, fus_w2, fus_b2 = params
    out = {}
    for k in hypergraph_dict:
        G = get_norm_adj_mat_dense(hypergraph_dict[k])
        xb = jnp.maximum(x, 0.0) + hgc_b
        edge = G.T @ xb
        h = G @ edge
        h = jax.nn.softmax(h, axis=1)
        node = h @ fc1_w.T
        emb = jnp.stack([x, node], axis=0)                       # (2, N, D)
        sc = jnp.tanh(emb @ fus_w1.T + fus_b1) @ fus_w2.T + fus_b2
        sc = jax.nn.softmax(sc, axis=0)
        x = jnp.sum(sc * emb, axis=0)
        out[k] = (x, edge)
    return out


# TODO(synk): self.gat1 (HGATLayer), self.batch_norm1 and self.embedding are
# constructed in HGNN_ATT.__init__ but never used in forward; not implemented.


if __name__ == "__main__":
    key = jax.random.PRNGKey(0)
    D = 128            # input_size == n_hid == output_size (emb dim, lane-aligned)
    N_USERS, N_ITEMS = 64, 64        # multiples of 8 -> tile-aligned half slices
    N = N_USERS + N_ITEMS

    k_x, k_g1, k_g2, k_p = jax.random.split(key, 4)
    x = jax.random.normal(k_x, (N, D), jnp.float32)
    # two synthetic sub-hypergraph interaction matrices (binary, COO-equivalent)
    inter1 = (jax.random.uniform(k_g1, (N_USERS, N_ITEMS)) < 0.3).astype(jnp.float32)
    inter2 = (jax.random.uniform(k_g2, (N_USERS, N_ITEMS)) < 0.3).astype(jnp.float32)
    hypergraph_dict = {"sub0": inter1, "sub1": inter2}
    root_indices = jnp.array([0, 1, 2, 3], dtype=jnp.int32)

    params = init_params(k_p, D)

    embedding_list = hgnn_att_forward(x, hypergraph_dict, root_indices, params)
    for k_ in embedding_list:
        jax.block_until_ready(embedding_list[k_][0])
        jax.block_until_ready(embedding_list[k_][1])

    # Validate against the pure-JAX f32 reference (bf16 MXU operands + approx
    # reciprocal => loosened tolerance vs. the all-f32 variant).
    ref = hgnn_att_reference(x, hypergraph_dict, params)
    for k_ in embedding_list:
        np.testing.assert_allclose(np.asarray(embedding_list[k_][0]),
                                   np.asarray(ref[k_][0]), atol=5e-2, rtol=5e-2)
        np.testing.assert_allclose(np.asarray(embedding_list[k_][1]),
                                   np.asarray(ref[k_][1]), atol=5e-2, rtol=5e-2)

    print("KERNEL_OK")
</pallas_src>

<mosaic_0001>
module attributes {stable_mosaic.version = 11 : i64} {
  func.func @_hgnn_att_fused_kernel(%arg0: i32, %arg1: memref<128x128xf32, #tpu.memory_space<vmem>>, %arg2: memref<1x64x64xbf16, #tpu.memory_space<vmem>>, %arg3: memref<1x64x64xbf16, #tpu.memory_space<vmem>>, %arg4: memref<1x128xf32, #tpu.memory_space<vmem>>, %arg5: memref<128x128xbf16, #tpu.memory_space<vmem>>, %arg6: memref<128x128xbf16, #tpu.memory_space<vmem>>, %arg7: memref<1x128xf32, #tpu.memory_space<vmem>>, %arg8: memref<1x128xf32, #tpu.memory_space<vmem>>, %arg9: memref<1x1xf32, #tpu.memory_space<smem>>, %arg10: memref<1x128x128xf32, #tpu.memory_space<vmem>>, %arg11: memref<1x128x128xf32, #tpu.memory_space<vmem>>, %arg12: memref<128x128xf32, #tpu.memory_space<vmem>>) attributes {dimension_semantics = [#tpu.dimension_semantics<arbitrary>], iteration_bounds = array<i64: 2>, scalar_prefetch = 0 : i64, scratch_operands = 1 : i64, tpu.core_type = #tpu.core_type<tc>, window_params = [{pipeline_mode = #tpu.pipeline_mode<synchronous>, transform_indices = @transform_0, window_bounds = array<i64: 128, 128>}, {transform_indices = @transform_1, window_bounds = array<i64: 1, 64, 64>}, {transform_indices = @transform_2, window_bounds = array<i64: 1, 64, 64>}, {pipeline_mode = #tpu.pipeline_mode<synchronous>, transform_indices = @transform_3, window_bounds = array<i64: 1, 128>}, {pipeline_mode = #tpu.pipeline_mode<synchronous>, transform_indices = @transform_4, window_bounds = array<i64: 128, 128>}, {pipeline_mode = #tpu.pipeline_mode<synchronous>, transform_indices = @transform_5, window_bounds = array<i64: 128, 128>}, {pipeline_mode = #tpu.pipeline_mode<synchronous>, transform_indices = @transform_6, window_bounds = array<i64: 1, 128>}, {pipeline_mode = #tpu.pipeline_mode<synchronous>, transform_indices = @transform_7, window_bounds = array<i64: 1, 128>}, {transform_indices = @transform_8, window_bounds = array<i64: 1, 1>}, {transform_indices = @transform_9, window_bounds = array<i64: 1, 128, 128>}, {transform_indices = @transform_10, window_bounds = array<i64: 1, 128, 128>}]} {
    %c0_i32 = arith.constant 0 : i32
    %0 = arith.cmpi eq, %arg0, %c0_i32 : i32
    %1 = arith.extui %0 : i1 to i32
    %c0_i32_0 = arith.constant 0 : i32
    %2 = arith.cmpi ne, %1, %c0_i32_0 : i32
    scf.if %2 {
      %c0_53 = arith.constant 0 : index
      %c0_54 = arith.constant 0 : index
      %139 = vector.load %arg1[%c0_53, %c0_54] : memref<128x128xf32, #tpu.memory_space<vmem>>, vector<128x128xf32>
      %c0_55 = arith.constant 0 : index
      %c0_56 = arith.constant 0 : index
      %140 = vector.load %arg12[%c0_55, %c0_56] : memref<128x128xf32, #tpu.memory_space<vmem>>, vector<128x128xf32>
      tpu.vector_store %arg12[%c0_55, %c0_56], %139 {strides = array<i32>} : memref<128x128xf32, #tpu.memory_space<vmem>>, vector<128x128xf32>,
    } else {
    }
    %c0 = arith.constant 0 : index
    %c0_1 = arith.constant 0 : index
    %3 = vector.load %arg12[%c0, %c0_1] : memref<128x128xf32, #tpu.memory_space<vmem>>, vector<128x128xf32>
    %cst = arith.constant 0.000000e+00 : f32
    %4 = vector.broadcast %cst : f32 to vector<128x128xf32>
    %5 = arith.maximumf %3, %4 : vector<128x128xf32>
    %c0_2 = arith.constant 0 : index
    %c0_3 = arith.constant 0 : index
    %6 = vector.load %arg4[%c0_2, %c0_3] : memref<1x128xf32, #tpu.memory_space<vmem>>, vector<1x128xf32>
    %7 = vector.broadcast %6 : vector<1x128xf32> to vector<128x128xf32>
    %8 = arith.addf %5, %7 : vector<128x128xf32>
    %9 = arith.truncf %8 : vector<128x128xf32> to vector<128x128xbf16>
    %c0_4 = arith.constant 0 : index
    %c0_5 = arith.constant 0 : index
    %c0_6 = arith.constant 0 : index
    %10 = vector.load %arg2[%c0_4, %c0_5, %c0_6] : memref<1x64x64xbf16, #tpu.memory_space<vmem>>, vector<1x64x64xbf16>
    %11 = vector.shape_cast %10 : vector<1x64x64xbf16> to vector<64x64xbf16>
    %c0_7 = arith.constant 0 : index
    %c0_8 = arith.constant 0 : index
    %c0_9 = arith.constant 0 : index
    %12 = vector.load %arg3[%c0_7, %c0_8, %c0_9] : memref<1x64x64xbf16, #tpu.memory_space<vmem>>, vector<1x64x64xbf16>
    %13 = vector.shape_cast %12 : vector<1x64x64xbf16> to vector<64x64xbf16>
    %14 = vector.extract_strided_slice %9 {offsets = [64, 0], sizes = [64, 128], strides = [1, 1]} : vector<128x128xbf16> to vector<64x128xbf16>
    %cst_10 = arith.constant dense<0.000000e+00> : vector<64x128xf32>
    %15 = tpu.matmul %11, %14, %cst_10 {dimension_numbers = #tpu.dot_dimension_numbers<[1], [0], [0], [1], [0, 0, 1, 1], [], []>} : vector<64x64xbf16>, vector<64x128xbf16>, vector<64x128xf32> -> vector<64x128xf32>
    %16 = vector.extract_strided_slice %9 {offsets = [0, 0], sizes = [64, 128], strides = [1, 1]} : vector<128x128xbf16> to vector<64x128xbf16>
    %cst_11 = arith.constant dense<0.000000e+00> : vector<64x128xf32>
    %17 = tpu.matmul %13, %16, %cst_11 {dimension_numbers = #tpu.dot_dimension_numbers<[1], [0], [0], [1], [0, 0, 1, 1], [], []>} : vector<64x64xbf16>, vector<64x128xbf16>, vector<64x128xf32> -> vector<64x128xf32>
    %c0_12 = arith.constant 0 : index
    %c0_13 = arith.constant 0 : index
    %c0_14 = arith.constant 0 : index
    %18 = vector.load %arg11[%c0_12, %c0_13, %c0_14] : memref<1x128x128xf32, #tpu.memory_space<vmem>>, vector<1x64x128xf32>
    %19 = vector.shape_cast %18 : vector<1x64x128xf32> to vector<64x128xf32>
    %20 = vector.shape_cast %15 : vector<64x128xf32> to vector<1x64x128xf32>
    tpu.vector_store %arg11[%c0_12, %c0_13, %c0_14], %20 {strides = array<i32>} : memref<1x128x128xf32, #tpu.memory_space<vmem>>, vector<1x64x128xf32>,
    %c0_15 = arith.constant 0 : index
    %c64 = arith.constant 64 : index
    %c0_16 = arith.constant 0 : index
    %21 = vector.load %arg11[%c0_15, %c64, %c0_16] : memref<1x128x128xf32, #tpu.memory_space<vmem>>, vector<1x64x128xf32>
    %22 = vector.shape_cast %21 : vector<1x64x128xf32> to vector<64x128xf32>
    %23 = vector.shape_cast %17 : vector<64x128xf32> to vector<1x64x128xf32>
    tpu.vector_store %arg11[%c0_15, %c64, %c0_16], %23 {strides = array<i32>} : memref<1x128x128xf32, #tpu.memory_space<vmem>>, vector<1x64x128xf32>,
    %24 = arith.truncf %17 : vector<64x128xf32> to vector<64x128xbf16>
    %cst_17 = arith.constant dense<0.000000e+00> : vector<64x128xf32>
    %25 = tpu.matmul %11, %24, %cst_17 {dimension_numbers = #tpu.dot_dimension_numbers<[1], [0], [0], [1], [0, 0, 1, 1], [], []>} : vector<64x64xbf16>, vector<64x128xbf16>, vector<64x128xf32> -> vector<64x128xf32>
    %26 = arith.truncf %15 : vector<64x128xf32> to vector<64x128xbf16>
    %cst_18 = arith.constant dense<0.000000e+00> : vector<64x128xf32>
    %27 = tpu.matmul %13, %26, %cst_18 {dimension_numbers = #tpu.dot_dimension_numbers<[1], [0], [0], [1], [0, 0, 1, 1], [], []>} : vector<64x64xbf16>, vector<64x128xbf16>, vector<64x128xf32> -> vector<64x128xf32>
    %c0_19 = arith.constant 0 : index
    %c0_20 = arith.constant 0 : index
    %28 = vector.load %arg5[%c0_19, %c0_20] : memref<128x128xbf16, #tpu.memory_space<vmem>>, vector<128x128xbf16>
    %c0_21 = arith.constant 0 : index
    %c0_22 = arith.constant 0 : index
    %29 = vector.load %arg6[%c0_21, %c0_22] : memref<128x128xbf16, #tpu.memory_space<vmem>>, vector<128x128xbf16>
    %c0_23 = arith.constant 0 : index
    %c0_24 = arith.constant 0 : index
    %30 = vector.load %arg7[%c0_23, %c0_24] : memref<1x128xf32, #tpu.memory_space<vmem>>, vector<1x128xf32>
    %c0_25 = arith.constant 0 : index
    %c0_26 = arith.constant 0 : index
    %31 = vector.load %arg8[%c0_25, %c0_26] : memref<1x128xf32, #tpu.memory_space<vmem>>, vector<1x128xf32>
    %c0_27 = arith.constant 0 : index
    %c0_28 = arith.constant 0 : index
    %32 = memref.load %arg9[%c0_27, %c0_28] : memref<1x1xf32, #tpu.memory_space<smem>>
    %33 = vector.extract_strided_slice %3 {offsets = [0, 0], sizes = [64, 128], strides = [1, 1]} : vector<128x128xf32> to vector<64x128xf32>
    %cst_29 = arith.constant dense<0xFF800000> : vector<64xf32>
    %34 = vector.multi_reduction <maximumf>, %25, %cst_29 [1] : vector<64x128xf32> to vector<64xf32>
    %35 = vector.shape_cast %34 : vector<64xf32> to vector<64x1xf32>
    %36 = vector.broadcast %35 : vector<64x1xf32> to vector<64x128xf32>
    %37 = arith.subf %25, %36 : vector<64x128xf32>
    %38 = math.exp %37 : vector<64x128xf32>
    %cst_30 = arith.constant dense<0.000000e+00> : vector<64xf32>
    %39 = vector.multi_reduction <add>, %38, %cst_30 [1] : vector<64x128xf32> to vector<64xf32>
    %40 = vector.shape_cast %39 : vector<64xf32> to vector<64x1xf32>
    %41 = tpu.reciprocal %40 {approx = true} : vector<64x1xf32> -> vector<64x1xf32>
    %42 = vector.broadcast %41 : vector<64x1xf32> to vector<64x128xf32>
    %43 = arith.mulf %38, %42 : vector<64x128xf32>
    %44 = arith.truncf %43 : vector<64x128xf32> to vector<64x128xbf16>
    %cst_31 = arith.constant dense<0.000000e+00> : vector<64x128xf32>
    %45 = tpu.matmul %44, %28, %cst_31 {dimension_numbers = #tpu.dot_dimension_numbers<[1], [0], [0], [1], [0, 0, 1, 1], [], []>} : vector<64x128xbf16>, vector<128x128xbf16>, vector<64x128xf32> -> vector<64x128xf32>
    %46 = arith.truncf %33 : vector<64x128xf32> to vector<64x128xbf16>
    %cst_32 = arith.constant dense<0.000000e+00> : vector<64x128xf32>
    %47 = tpu.matmul %46, %29, %cst_32 {dimension_numbers = #tpu.dot_dimension_numbers<[1], [0], [0], [1], [0, 0, 1, 1], [], []>} : vector<64x128xbf16>, vector<128x128xbf16>, vector<64x128xf32> -> vector<64x128xf32>
    %48 = vector.broadcast %30 : vector<1x128xf32> to vector<64x128xf32>
    %49 = arith.addf %47, %48 : vector<64x128xf32>
    %50 = math.tanh %49 : vector<64x128xf32>
    %51 = arith.truncf %45 : vector<64x128xf32> to vector<64x128xbf16>
    %cst_33 = arith.constant dense<0.000000e+00> : vector<64x128xf32>
    %52 = tpu.matmul %51, %29, %cst_33 {dimension_numbers = #tpu.dot_dimension_numbers<[1], [0], [0], [1], [0, 0, 1, 1], [], []>} : vector<64x128xbf16>, vector<128x128xbf16>, vector<64x128xf32> -> vector<64x128xf32>
    %53 = vector.broadcast %30 : vector<1x128xf32> to vector<64x128xf32>
    %54 = arith.addf %52, %53 : vector<64x128xf32>
    %55 = math.tanh %54 : vector<64x128xf32>
    %56 = vector.broadcast %31 : vector<1x128xf32> to vector<64x128xf32>
    %57 = arith.mulf %50, %56 : vector<64x128xf32>
    %cst_34 = arith.constant dense<0.000000e+00> : vector<64xf32>
    %58 = vector.multi_reduction <add>, %57, %cst_34 [1] : vector<64x128xf32> to vector<64xf32>
    %59 = vector.shape_cast %58 : vector<64xf32> to vector<64x1xf32>
    %60 = vector.broadcast %32 : f32 to vector<64x1xf32>
    %61 = arith.addf %59, %60 : vector<64x1xf32>
    %62 = vector.broadcast %31 : vector<1x128xf32> to vector<64x128xf32>
    %63 = arith.mulf %55, %62 : vector<64x128xf32>
    %cst_35 = arith.constant dense<0.000000e+00> : vector<64xf32>
    %64 = vector.multi_reduction <add>, %63, %cst_35 [1] : vector<64x128xf32> to vector<64xf32>
    %65 = vector.shape_cast %64 : vector<64xf32> to vector<64x1xf32>
    %66 = vector.broadcast %32 : f32 to vector<64x1xf32>
    %67 = arith.addf %65, %66 : vector<64x1xf32>
    %68 = arith.maximumf %61, %67 : vector<64x1xf32>
    %69 = arith.subf %61, %68 : vector<64x1xf32>
    %70 = math.exp %69 : vector<64x1xf32>
    %71 = arith.subf %67, %68 : vector<64x1xf32>
    %72 = math.exp %71 : vector<64x1xf32>
    %73 = arith.addf %70, %72 : vector<64x1xf32>
    %74 = tpu.reciprocal %73 {approx = true} : vector<64x1xf32> -> vector<64x1xf32>
    %75 = arith.mulf %70, %74 : vector<64x1xf32>
    %76 = vector.broadcast %75 : vector<64x1xf32> to vector<64x128xf32>
    %77 = arith.mulf %76, %33 : vector<64x128xf32>
    %78 = arith.mulf %72, %74 : vector<64x1xf32>
    %79 = vector.broadcast %78 : vector<64x1xf32> to vector<64x128xf32>
    %80 = arith.mulf %79, %45 : vector<64x128xf32>
    %81 = arith.addf %77, %80 : vector<64x128xf32>
    %82 = vector.extract_strided_slice %3 {offsets = [64, 0], sizes = [64, 128], strides = [1, 1]} : vector<128x128xf32> to vector<64x128xf32>
    %cst_36 = arith.constant dense<0xFF800000> : vector<64xf32>
    %83 = vector.multi_reduction <maximumf>, %27, %cst_36 [1] : vector<64x128xf32> to vector<64xf32>
    %84 = vector.shape_cast %83 : vector<64xf32> to vector<64x1xf32>
    %85 = vector.broadcast %84 : vector<64x1xf32> to vector<64x128xf32>
    %86 = arith.subf %27, %85 : vector<64x128xf32>
    %87 = math.exp %86 : vector<64x128xf32>
    %cst_37 = arith.constant dense<0.000000e+00> : vector<64xf32>
    %88 = vector.multi_reduction <add>, %87, %cst_37 [1] : vector<64x128xf32> to vector<64xf32>
    %89 = vector.shape_cast %88 : vector<64xf32> to vector<64x1xf32>
    %90 = tpu.reciprocal %89 {approx = true} : vector<64x1xf32> -> vector<64x1xf32>
    %91 = vector.broadcast %90 : vector<64x1xf32> to vector<64x128xf32>
    %92 = arith.mulf %87, %91 : vector<64x128xf32>
    %93 = arith.truncf %92 : vector<64x128xf32> to vector<64x128xbf16>
    %cst_38 = arith.constant dense<0.000000e+00> : vector<64x128xf32>
    %94 = tpu.matmul %93, %28, %cst_38 {dimension_numbers = #tpu.dot_dimension_numbers<[1], [0], [0], [1], [0, 0, 1, 1], [], []>} : vector<64x128xbf16>, vector<128x128xbf16>, vector<64x128xf32> -> vector<64x128xf32>
    %95 = arith.truncf %82 : vector<64x128xf32> to vector<64x128xbf16>
    %cst_39 = arith.constant dense<0.000000e+00> : vector<64x128xf32>
    %96 = tpu.matmul %95, %29, %cst_39 {dimension_numbers = #tpu.dot_dimension_numbers<[1], [0], [0], [1], [0, 0, 1, 1], [], []>} : vector<64x128xbf16>, vector<128x128xbf16>, vector<64x128xf32> -> vector<64x128xf32>
    %97 = vector.broadcast %30 : vector<1x128xf32> to vector<64x128xf32>
    %98 = arith.addf %96, %97 : vector<64x128xf32>
    %99 = math.tanh %98 : vector<64x128xf32>
    %100 = arith.truncf %94 : vector<64x128xf32> to vector<64x128xbf16>
    %cst_40 = arith.constant dense<0.000000e+00> : vector<64x128xf32>
    %101 = tpu.matmul %100, %29, %cst_40 {dimension_numbers = #tpu.dot_dimension_numbers<[1], [0], [0], [1], [0, 0, 1, 1], [], []>} : vector<64x128xbf16>, vector<128x128xbf16>, vector<64x128xf32> -> vector<64x128xf32>
    %102 = vector.broadcast %30 : vector<1x128xf32> to vector<64x128xf32>
    %103 = arith.addf %101, %102 : vector<64x128xf32>
    %104 = math.tanh %103 : vector<64x128xf32>
    %105 = vector.broadcast %31 : vector<1x128xf32> to vector<64x128xf32>
    %106 = arith.mulf %99, %105 : vector<64x128xf32>
    %cst_41 = arith.constant dense<0.000000e+00> : vector<64xf32>
    %107 = vector.multi_reduction <add>, %106, %cst_41 [1] : vector<64x128xf32> to vector<64xf32>
    %108 = vector.shape_cast %107 : vector<64xf32> to vector<64x1xf32>
    %109 = vector.broadcast %32 : f32 to vector<64x1xf32>
    %110 = arith.addf %108, %109 : vector<64x1xf32>
    %111 = vector.broadcast %31 : vector<1x128xf32> to vector<64x128xf32>
    %112 = arith.mulf %104, %111 : vector<64x128xf32>
    %cst_42 = arith.constant dense<0.000000e+00> : vector<64xf32>
    %113 = vector.multi_reduction <add>, %112, %cst_42 [1] : vector<64x128xf32> to vector<64xf32>
    %114 = vector.shape_cast %113 : vector<64xf32> to vector<64x1xf32>
    %115 = vector.broadcast %32 : f32 to vector<64x1xf32>
    %116 = arith.addf %114, %115 : vector<64x1xf32>
    %117 = arith.maximumf %110, %116 : vector<64x1xf32>
    %118 = arith.subf %110, %117 : vector<64x1xf32>
    %119 = math.exp %118 : vector<64x1xf32>
    %120 = arith.subf %116, %117 : vector<64x1xf32>
    %121 = math.exp %120 : vector<64x1xf32>
    %122 = arith.addf %119, %121 : vector<64x1xf32>
    %123 = tpu.reciprocal %122 {approx = true} : vector<64x1xf32> -> vector<64x1xf32>
    %124 = arith.mulf %119, %123 : vector<64x1xf32>
    %125 = vector.broadcast %124 : vector<64x1xf32> to vector<64x128xf32>
    %126 = arith.mulf %125, %82 : vector<64x128xf32>
    %127 = arith.mulf %121, %123 : vector<64x1xf32>
    %128 = vector.broadcast %127 : vector<64x1xf32> to vector<64x128xf32>
    %129 = arith.mulf %128, %94 : vector<64x128xf32>
    %130 = arith.addf %126, %129 : vector<64x128xf32>
    %c0_43 = arith.constant 0 : index
    %c0_44 = arith.constant 0 : index
    %131 = vector.load %arg12[%c0_43, %c0_44] : memref<128x128xf32, #tpu.memory_space<vmem>>, vector<64x128xf32>
    tpu.vector_store %arg12[%c0_43, %c0_44], %81 {strides = array<i32>} : memref<128x128xf32, #tpu.memory_space<vmem>>, vector<64x128xf32>,
    %c64_45 = arith.constant 64 : index
    %c0_46 = arith.constant 0 : index
    %132 = vector.load %arg12[%c64_45, %c0_46] : memref<128x128xf32, #tpu.memory_space<vmem>>, vector<64x128xf32>
    tpu.vector_store %arg12[%c64_45, %c0_46], %130 {strides = array<i32>} : memref<128x128xf32, #tpu.memory_space<vmem>>, vector<64x128xf32>,
    %c0_47 = arith.constant 0 : index
    %c0_48 = arith.constant 0 : index
    %c0_49 = arith.constant 0 : index
    %133 = vector.load %arg10[%c0_47, %c0_48, %c0_49] : memref<1x128x128xf32, #tpu.memory_space<vmem>>, vector<1x64x128xf32>
    %134 = vector.shape_cast %133 : vector<1x64x128xf32> to vector<64x128xf32>
    %135 = vector.shape_cast %81 : vector<64x128xf32> to vector<1x64x128xf32>
    tpu.vector_store %arg10[%c0_47, %c0_48, %c0_49], %135 {strides = array<i32>} : memref<1x128x128xf32, #tpu.memory_space<vmem>>, vector<1x64x128xf32>,
    %c0_50 = arith.constant 0 : index
    %c64_51 = arith.constant 64 : index
    %c0_52 = arith.constant 0 : index
    %136 = vector.load %arg10[%c0_50, %c64_51, %c0_52] : memref<1x128x128xf32, #tpu.memory_space<vmem>>, vector<1x64x128xf32>
    %137 = vector.shape_cast %136 : vector<1x64x128xf32> to vector<64x128xf32>
    %138 = vector.shape_cast %130 : vector<64x128xf32> to vector<1x64x128xf32>
    tpu.vector_store %arg10[%c0_50, %c64_51, %c0_52], %138 {strides = array<i32>} : memref<1x128x128xf32, #tpu.memory_space<vmem>>, vector<1x64x128xf32>,
    return
  }
  func.func @transform_0(%arg0: i32) -> (i32, i32) {
    %c0_i32 = arith.constant 0 : i32
    %c0_i32_0 = arith.constant 0 : i32
    %c0_i32_1 = arith.constant 0 : i32
    return %c0_i32, %c0_i32_0 : i32, i32
  }
  func.func @transform_1(%arg0: i32) -> (i32, i32, i32) {
    %c0_i32 = arith.constant 0 : i32
    %c0_i32_0 = arith.constant 0 : i32
    %c0_i32_1 = arith.constant 0 : i32
    return %arg0, %c0_i32, %c0_i32_0 : i32, i32, i32
  }
  func.func @transform_2(%arg0: i32) -> (i32, i32, i32) {
    %c0_i32 = arith.constant 0 : i32
    %c0_i32_0 = arith.constant 0 : i32
    %c0_i32_1 = arith.constant 0 : i32
    return %arg0, %c0_i32, %c0_i32_0 : i32, i32, i32
  }
  func.func @transform_3(%arg0: i32) -> (i32, i32) {
    %c0_i32 = arith.constant 0 : i32
    %c0_i32_0 = arith.constant 0 : i32
    %c0_i32_1 = arith.constant 0 : i32
    return %c0_i32, %c0_i32_0 : i32, i32
  }
  func.func @transform_4(%arg0: i32) -> (i32, i32) {
    %c0_i32 = arith.constant 0 : i32
    %c0_i32_0 = arith.constant 0 : i32
    %c0_i32_1 = arith.constant 0 : i32
    return %c0_i32, %c0_i32_0 : i32, i32
  }
  func.func @transform_5(%arg0: i32) -> (i32, i32) {
    %c0_i32 = arith.constant 0 : i32
    %c0_i32_0 = arith.constant 0 : i32
    %c0_i32_1 = arith.constant 0 : i32
    return %c0_i32, %c0_i32_0 : i32, i32
  }
  func.func @transform_6(%arg0: i32) -> (i32, i32) {
    %c0_i32 = arith.constant 0 : i32
    %c0_i32_0 = arith.constant 0 : i32
    %c0_i32_1 = arith.constant 0 : i32
    return %c0_i32, %c0_i32_0 : i32, i32
  }
  func.func @transform_7(%arg0: i32) -> (i32, i32) {
    %c0_i32 = arith.constant 0 : i32
    %c0_i32_0 = arith.constant 0 : i32
    %c0_i32_1 = arith.constant 0 : i32
    return %c0_i32, %c0_i32_0 : i32, i32
  }
  func.func @transform_8(%arg0: i32) -> (i32, i32) {
    %c0_i32 = arith.constant 0 : i32
    %c0_i32_0 = arith.constant 0 : i32
    %c0_i32_1 = arith.constant 0 : i32
    return %c0_i32, %c0_i32_0 : i32, i32
  }
  func.func @transform_9(%arg0: i32) -> (i32, i32, i32) {
    %c0_i32 = arith.constant 0 : i32
    %c0_i32_0 = arith.constant 0 : i32
    %c0_i32_1 = arith.constant 0 : i32
    return %arg0, %c0_i32, %c0_i32_0 : i32, i32, i32
  }
  func.func @transform_10(%arg0: i32) -> (i32, i32, i32) {
    %c0_i32 = arith.constant 0 : i32
    %c0_i32_0 = arith.constant 0 : i32
    %c0_i32_1 = arith.constant 0 : i32
    return %arg0, %c0_i32, %c0_i32_0 : i32, i32, i32
  }
}

</mosaic_0001>

<bundles_post_ra>
// kernel: tpu_custom_call.1
= control target key start
LH: loop header
LB: loop body
LE: loop exit
PB: predicated region body
PF: predicated region fallthrough
CT: control target
= control target key end

     0   :  { %s4347_s0 = inlined_call_operand.hbm [shape: f32[128,128], index: 0, kind: input, shape index: {}]   ;;  %s4348_s1 = inlined_call_operand.hbm [shape: bf16[2,64,64], index: 1, kind: input, shape index: {}]   ;;  %s4349_s2 = inlined_call_operand.hbm [shape: bf16[2,64,64], index: 2, kind: input, shape index: {}]   ;;  %s4350_s3 = inlined_call_operand.vmem [shape: f32[1,128], index: 3, kind: input, shape index: {}]   ;;  %s4351_s4 = inlined_call_operand.hbm [shape: bf16[128,128], index: 4, kind: input, shape index: {}]   ;;  %s4352_s5 = inlined_call_operand.hbm [shape: bf16[128,128], index: 5, kind: input, shape index: {}]   ;;  %s4353_s6 = inlined_call_operand.vmem [shape: f32[1,128], index: 6, kind: input, shape index: {}]   ;;  %s4354_s7 = inlined_call_operand.vmem [shape: f32[1,128], index: 7, kind: input, shape index: {}]   ;;  %s4355_s8 = inlined_call_operand.<no memory space> [shape: f32[1,1], index: 8, kind: input, shape index: {}]   ;;  %s4356_s9 = inlined_call_operand.hbm [shape: f32[2,128,128], index: 9, kind: output, shape index: {0}]   ;;  %s4357_s10 = inlined_call_operand.hbm [shape: f32[2,128,128], index: 10, kind: output, shape index: {1}]  }
   0x1   :  { %4381 = sst [smem:[#allocation27_spill]] %s4348_s1 }
   0x2   :  { %4382 = sst [smem:[#allocation28_spill]] %s4350_s3 }
   0x3   :  { %4383 = sst [smem:[#allocation29_spill]] %s4351_s4 }
   0x4   :  { %4384 = sst [smem:[#allocation30_spill]] %s4353_s6 }
   0x5   :  { %4385 = sst [smem:[#allocation31_spill]] %s4354_s7 }
   0x6   :  { %4386 = sst [smem:[#allocation32_spill]] %s4356_s9 }
   0x7   :  { %4387 = sst [smem:[#allocation33_spill]] %s4357_s10 }
   0x8   :  { %16 = sst [smem:[#allocation3]] %s4355_s8 }
   0x9   :  { %17 = vsyncpa [#allocation5], 0 }
   0xa   :  { %18 = vsyncpa [#allocation8], 0 }
   0xb   :  { %20 = vsyncpa [#allocation8 + $0x1], 0 }
   0xc   :  { %21 = vsyncpa [#allocation11], 0 }
   0xd   :  { %22 = vsyncpa [#allocation6], 0 }
   0xe   :  { %24 = vsyncpa [#allocation6 + $0x1], 0 }
   0xf   :  { %25 = vsyncpa [#allocation15], 0 }
  0x10   :  { %27 = vsyncpa [#allocation15 + $0x1], 0  ;;  %s3316_s15 = smov 0   ;;  %s3318_s16 = smov 0  }
  0x11   :  { %s3320_s17 = smov 0   ;;  %s3322_s18 = smov 0  }
  0x12 LB: > { %4388 = sst [smem:[#allocation21_spill]] %s3231_s15  ;;  %s3337_s8 = sadd.s32 4294967295, %s3243_s18   ;;  %s3243_s18 = sphi %s3322_s18, %s4429_s18   ;;  %s3239_s17 = sphi %s3320_s17, %s4431_s17   ;;  %s3235_s16 = sphi %s3318_s16, %s4433_s16   ;;  %s3231_s15 = sphi %s3316_s15, %s4432_s15  }
  0x13   : > { %4389 = sst [smem:[#allocation22_spill]] %s3239_s17  ;;  %s2245_s19 = sadd.s32 4294967294, %s3243_s18  }
  0x14   : > { %p74_p0 = scmp.ne.s32.totalorder %s3235_s16, %s3231_s15  ;;  %p4358_p1 = scmp.eq.s32.totalorder %s3337_s8, 0 }
  0x15   : > { %p256_p3 = scmp.eq.s32.totalorder %s2245_s19, 1  ;;  %p2246_p5 = scmp.ge.s32.totalorder %s3243_s18, 1 }
  0x16   : > { %p3346_p4 = por %p4358_p1, %p74_p0  ;;  %p289_p7 = scmp.lt.s32.totalorder %s3243_s18, 3 }
  0x17   : > { %p3351_p6 = por %p256_p3, %p74_p0  ;;  %s3245_s23 = smov [#allocation10]  }
  0x18   : > { %s4390_s20 = scalar_select %p3346_p4, 1, 0 }
  0x19   : > { %s4391_s21 = scalar_select %p3351_p6, 1, 0 }
  0x1a   : > { %p3357_p9 = pnand %p2246_p5, %p289_p7  ;;  %s317_s24 = sshll.u32 %s3245_s23, 4  ;;  %s3361_s24 = int_to_ptr.vmem [resolvable:$true] %s317_s24 }
  0x1b   : > { %4392 = sst [smem:[#allocation23_spill]] %s4391_s21  ;;  %s3373_s26 = sadd.s32 1, %s3243_s18  }
  0x1c   : > { %s4393_s22 = scalar_select %p3357_p9, 1, 0 }
  0x1d   : > { %p2653_p10 = pneg %p3357_p9  ;;  %4395 = sst [smem:[#allocation24_spill]] %s3373_s26 }
  0x1e   : > { %s61_s27 = sadd.s32 1, %s3239_s17  ;;  %s58_s28 = ssub.s32 %s3243_s18, %s3373_s26 }
  0x1f   : > { %p3368_p12 = pnand %p2653_p10, %p4358_p1  ;;  %s4396_s4 = sld [smem:[#allocation29_spill]] }
  0x21   : > { %s4394_s25 = scalar_select %p3368_p12, 1, 0 }
  0x22   : > { %p3386_p0 = pneg %p3368_p12 }
  0x25   : > { %s2993_s11 = scalar_lea.hbm %s4396_s4, 1024 }
  0x26   : > { %p2994_p13 = scmp.ne.s32.totalorder %s4396_s4, %s2993_s11  ;;  %p3000_p7 = scmp.lt.u32.totalorder %s2993_s11, %s4396_s4 }
  0x28   : > { %p2996_p3 = pnand %p3386_p0, %p2994_p13 }
  0x2a   : > { %p2997_p5 = pneg %p2996_p3 }
  0x2c   : > { %p3002_p10 = pnand %p3000_p7, %p2997_p5 }
  0x2e   : > { %3005 = shalt.err (!%p3002_p10)
}
  0x2f   : > { %s3006_s29 = scalar_lea.vmem %s3361_s24, 1024  ;;  %p3014_p2 = scmp.lt.s32.totalorder %s3361_s24, %s3361_s24 }
  0x30   : > { %p3007_p11 = scmp.ne.s32.totalorder %s3361_s24, %s3006_s29  ;;  %p3015_p6 = scmp.lt.s32.totalorder %s3006_s29, %s3006_s29 }
  0x32   : > { %p3009_p8 = pnand %p3007_p11, %p3386_p0  ;;  %p3016_p13 = por %p3015_p6, %p3014_p2 }
  0x34   : > { %p3010_p1 = pneg %p3009_p8 }
  0x36   : > { %p3017_p3 = pnand %p3016_p13, %p3010_p1 }
  0x38   : > { %3020 = shalt.err (!%p3017_p3)
}
  0x39   : > { %s4363_s30 = smov 64   ;;  %s4365_s11 = smov 4  }
  0x3a   : > { %2659 = dma.hbm_to_vmem [thread:$0]  (!%p3368_p12), %s4396_s4, 1024, %s3361_s24, [#allocation11], %s4363_s30, %s4363_s30, %s4365_s11  }
  0x3b   : > { %p59_p1 = scmp.eq.s32.totalorder %s58_s28, 0  ;;  %p68_p2 = scmp.ne.s32.totalorder %s3239_s17, %s3235_s16 }
  0x3c   : > { %p69_p6 = scmp.eq.s32.totalorder %s3243_s18, 0  ;;  %p2680_p8 = scmp.lt.s32.totalorder %s3243_s18, 2 }
  0x3d   : > { %s3415_s19 = scalar_select %p59_p1, %s3239_s17, %s61_s27  }
  0x3e   : > { %p70_p11 = por %p69_p6, %p68_p2  ;;  %p4399_p5 = scmp.eq.s32.totalorder %s3337_s8, 1 }
  0x3f   : > { %4398 = sst [smem:[#allocation25_spill]] %s3415_s19  ;;  %s353_s29 = sand.u32 1, %s3243_s18  }
  0x40   : > { %p3419_p7 = por %p4399_p5, %p68_p2  ;;  %s355_s26 = sand.u32 1, %s3239_s17  }
  0x41   : > { %s3425_s21 = sshll.u32 %s355_s26, 5  ;;  %s4367_s15 = sshll.u32 %s3243_s18, 9 }
  0x42   : > { %s4400_s23 = scalar_select %p3419_p7, 1, 0 }
  0x43   : > { %s4402_s1 = sld [smem:[#allocation27_spill]]  ;;  %s357_s27 = scalar_lea.vmem [#allocation7], %s3425_s21 }
  0x44   : > { %4401 = sst [smem:[#allocation26_spill]] %s4400_s23  ;;  %s364_s13 = sshll.u32 %s357_s27, 4  ;;  %s3436_s13 = int_to_ptr.vmem [resolvable:$true] %s364_s13 }
  0x45   : > { %p3438_p10 = pnand %p2680_p8, %p70_p11  ;;  %s3442_s26 = scalar_lea.sflag [#allocation8], %s353_s29 }
  0x47   : > { %s4403_s30 = scalar_select %p3438_p10, 1, 0 }
  0x48   : > { %p4378_p3 = pneg %p3438_p10 }
  0x49   : > { %s3433_s12 = scalar_lea.hbm %s4402_s1, %s4367_s15  ;;  %s3026_s27 = scalar_lea.hbm %s4402_s1, 1024 }
  0x4a   : > { %s3021_s11 = scalar_lea.hbm %s3433_s12, 512  ;;  %p3027_p6 = scmp.lt.u32.totalorder %s3433_s12, %s4402_s1 }
  0x4b   : > { %p3022_p13 = scmp.ne.s32.totalorder %s3433_s12, %s3021_s11  ;;  %p3028_p8 = scmp.lt.u32.totalorder %s3026_s27, %s3021_s11 }
  0x4c   : > { %p3030_p5 = scmp.lt.u32.totalorder %s3021_s11, %s3433_s12 }
  0x4d   : > { %p3024_p1 = pnand %p4378_p3, %p3022_p13  ;;  %p3029_p11 = por %p3028_p8, %p3027_p6 }
  0x4f   : > { %p3025_p2 = pneg %p3024_p1  ;;  %p3031_p7 = por %p3030_p5, %p3029_p11 }
  0x51   : > { %p3032_p4 = pnand %p3031_p7, %p3025_p2 }
  0x53   : > { %3035 = shalt.err (!%p3032_p4)
}
  0x54   : > { %s3036_s29 = scalar_lea.vmem %s3436_s13, 512  ;;  %s3248_s24 = smov [#allocation7]  }
  0x55   : > { %p3037_p13 = scmp.ne.s32.totalorder %s3436_s13, %s3036_s29  ;;  %s3041_s28 = sshll.u32 %s3248_s24, 4  ;;  %s3042_s28 = int_to_ptr.vmem [resolvable:$false] %s3041_s28 }
  0x56   : > { %s3043_s4 = scalar_lea.vmem %s3042_s28, 1024  ;;  %p3044_p12 = scmp.lt.s32.totalorder %s3436_s13, %s3042_s28 }
  0x57   : > { %p3039_p1 = pnand %p3037_p13, %p4378_p3  ;;  %p3045_p6 = scmp.lt.s32.totalorder %s3043_s4, %s3036_s29 }
  0x59   : > { %p3040_p9 = pneg %p3039_p1  ;;  %p3046_p8 = por %p3045_p6, %p3044_p12 }
  0x5b   : > { %p3047_p11 = pnand %p3046_p8, %p3040_p9 }
  0x5d   : > { %3050 = shalt.err (!%p3047_p11)
}
  0x5e   : > { %s4404_s15 = smov 4   ;;  %s4405_s11 = smov 64  }
  0x5f   : > { %2666 = dma.hbm_to_vmem [thread:$0]  (!%p3438_p10), %s3433_s12, 512, %s3436_s13, %s3442_s26, %s4405_s11, %s4405_s11, %s4404_s15  }
  0x60   : > { %s378_s27 = scalar_lea.vmem [#allocation9], %s3425_s21  ;;  %s3249_s1 = smov [#allocation4]  }
  0x61   : > { %s385_s24 = sshll.u32 %s378_s27, 4  ;;  %s301_s19 = sshll.u32 %s3249_s1, 4  ;;  %s302_s19 = int_to_ptr.vmem [resolvable:$true] %s301_s19  ;;  %s3499_s24 = int_to_ptr.vmem [resolvable:$true] %s385_s24 }
  0x62   : > { %s3051_s4 = scalar_lea.hbm %s4347_s0, 2048 }
  0x63   : > { %p3052_p4 = scmp.ne.s32.totalorder %s4347_s0, %s3051_s4  ;;  %p3058_p7 = scmp.lt.u32.totalorder %s3051_s4, %s4347_s0 }
  0x65   : > { %p3054_p9 = pnand %p3052_p4, %p3386_p0 }
  0x67   : > { %p3055_p12 = pneg %p3054_p9 }
  0x69   : > { %p3060_p2 = pnand %p3058_p7, %p3055_p12 }
  0x6b   : > { %3063 = shalt.err (!%p3060_p2)
}
  0x6c   : > { %s3064_s21 = scalar_lea.vmem %s302_s19, 2048  ;;  %p3072_p6 = scmp.lt.s32.totalorder %s302_s19, %s302_s19 }
  0x6d   : > { %p3065_p5 = scmp.ne.s32.totalorder %s302_s19, %s3064_s21  ;;  %p3073_p8 = scmp.lt.s32.totalorder %s3064_s21, %s3064_s21 }
  0x6f   : > { %p3067_p13 = pnand %p3065_p5, %p3386_p0  ;;  %p3074_p11 = por %p3073_p8, %p3072_p6 }
  0x71   : > { %p3068_p1 = pneg %p3067_p13 }
  0x73   : > { %p3075_p3 = pnand %p3074_p11, %p3068_p1 }
  0x75   : > { %3078 = shalt.err (!%p3075_p3)
}
  0x76   : > { %s3250_s1 = smov 128   ;;  %s3251_s9 = smov 8  }
  0x77   : > { %p4406_p4 = scmp.ne.s32.totalorder %s4394_s25, 0  ;;  %s4407_s23 = sshll.u32 %s3243_s18, 9 }
  0x78   : > { %s3497_s27 = scalar_lea.hbm %s4349_s2, %s4407_s23  ;;  %s3252_s29 = smov [#allocation12]  }
  0x79   : > { %2656 = dma.hbm_to_vmem [thread:$0]  (!%p4406_p4), %s4347_s0, 2048, %s302_s19, [#allocation5], %s3250_s1, %s3250_s1, %s3251_s9  }
  0x7a   : > { %s330_s28 = sshll.u32 %s3252_s29, 4  ;;  %s3079_s7 = scalar_lea.hbm %s4352_s5, 1024  ;;  %s331_s28 = int_to_ptr.vmem [resolvable:$true] %s330_s28 }
  0x7b   : > { %p3080_p3 = scmp.ne.s32.totalorder %s4352_s5, %s3079_s7  ;;  %p3086_p7 = scmp.lt.u32.totalorder %s3079_s7, %s4352_s5 }
  0x7d   : > { %p3082_p9 = pnand %p3080_p3, %p3386_p0 }
  0x7f   : > { %p3083_p12 = pneg %p3082_p9 }
  0x81   : > { %p3088_p2 = pnand %p3086_p7, %p3083_p12 }
  0x83   : > { %3091 = shalt.err (!%p3088_p2)
}
  0x84   : > { %s3092_s9 = scalar_lea.vmem %s331_s28, 1024  ;;  %p3100_p6 = scmp.lt.s32.totalorder %s331_s28, %s331_s28 }
  0x85   : > { %p3093_p5 = scmp.ne.s32.totalorder %s331_s28, %s3092_s9  ;;  %p3101_p8 = scmp.lt.s32.totalorder %s3092_s9, %s3092_s9 }
  0x87   : > { %p3095_p13 = pnand %p3093_p5, %p3386_p0  ;;  %p3102_p11 = por %p3101_p8, %p3100_p6 }
  0x89   : > { %p3096_p1 = pneg %p3095_p13 }
  0x8b   : > { %p3103_p10 = pnand %p3102_p11, %p3096_p1 }
  0x8d   : > { %3106 = shalt.err (!%p3103_p10)
}
  0x8e   : > { %2662 = dma.hbm_to_vmem [thread:$0]  (!%p4406_p4), %s4352_s5, 1024, %s331_s28, [#allocation11], %s4405_s11, %s4405_s11, %s4404_s15  }
  0x8f   : > { %s3107_s7 = scalar_lea.hbm %s3497_s27, 512  ;;  %p4408_p3 = scmp.ne.s32.totalorder %s4403_s30, 0 }
  0x90   : > { %p3108_p0 = scmp.ne.s32.totalorder %s3497_s27, %s3107_s7  ;;  %s3112_s10 = scalar_lea.hbm %s4349_s2, 1024 }
  0x91   : > { %p4409_p9 = pneg %p4408_p3  ;;  %p3113_p7 = scmp.lt.u32.totalorder %s3497_s27, %s4349_s2 }
  0x92   : > { %p3114_p2 = scmp.lt.u32.totalorder %s3112_s10, %s3107_s7  ;;  %p3116_p13 = scmp.lt.u32.totalorder %s3107_s7, %s3497_s27 }
  0x93   : > { %p3110_p12 = pnand %p3108_p0, %p4409_p9 }
  0x94   : > { %p3115_p5 = por %p3114_p2, %p3113_p7 }
  0x95   : > { %p3111_p10 = pneg %p3110_p12 }
  0x96   : > { %p3117_p1 = por %p3116_p13, %p3115_p5 }
  0x98   : > { %p3118_p6 = pnand %p3117_p1, %p3111_p10 }
  0x9a   : > { %3121 = shalt.err (!%p3118_p6)
}
  0x9b   : > { %s3122_s12 = scalar_lea.vmem %s3499_s24, 512  ;;  %p4410_p8 = pmov %p4409_p9 }
  0x9c   : > { %p3123_p4 = scmp.ne.s32.totalorder %s3499_s24, %s3122_s12  ;;  %s3253_s13 = smov [#allocation9]  }
  0x9d   : > { %s3127_s29 = sshll.u32 %s3253_s13, 4  ;;  %s3128_s29 = int_to_ptr.vmem [resolvable:$false] %s3127_s29 }
  0x9e   : > { %p3125_p11 = pnand %p3123_p4, %p4410_p8  ;;  %s3129_s28 = scalar_lea.vmem %s3128_s29, 1024 }
  0x9f   : > { %p3130_p9 = scmp.lt.s32.totalorder %s3499_s24, %s3128_s29  ;;  %p3131_p12 = scmp.lt.s32.totalorder %s3129_s28, %s3122_s12 }
  0xa0   : > { %p3126_p0 = pneg %p3125_p11 }
  0xa1   : > { %p3132_p7 = por %p3131_p12, %p3130_p9 }
  0xa3   : > { %p3133_p2 = pnand %p3132_p7, %p3126_p0 }
  0xa5   : > { %3136 = shalt.err (!%p3133_p2)
}
  0xa6   : > { %2669 = dma.hbm_to_vmem [thread:$0]  (!%p4408_p3), %s3497_s27, 512, %s3499_s24, %s3442_s26, %s4405_s11, %s4405_s11, %s4404_s15  }
  0xa7   : > { %p4411_p10 = scmp.ne.s32.totalorder %s4393_s22, 0 }
  0xa8   : > { %p4412_p5 = scmp.eq.s32.totalorder (!%p4411_p10), %s3337_s8, 0 }
  0xa9   : > { %397 = sbr.rel (%p4411_p10) target bundleno = 1697 (0x6a1), region = 56 }
  0xb0   : > { %3210 = dma.done.wait (%p4412_p5), [#allocation5], 2048   ;;  %p4413_p13 = pmov %p4412_p5 }
  0xb1   : > { %s403_s30 = sand.u32 1, %s3337_s8   ;;  %s3557_s4 = sand.u32 1, %s3235_s16  }
  0xb2   : > { %3212 = vsyncadd (%p4413_p13), [#allocation5], 4294965248  ;;  %s2259_s21 = sshll.u32 %s3557_s4, 5  ;;  %s404_s19 = scalar_lea.sflag [#allocation8], %s403_s30 }
  0xb3   : > { %s3560_s1 = scalar_lea.vmem [#allocation7], %s2259_s21  ;;  %p4414_p3 = scmp.ne.s32.totalorder %s4390_s20, 0 }
  0xb5   : > { %3214 = dma.done.wait (%p4414_p3), %s404_s19, 1024  }
  0xb6   : > { %3216 = vsyncadd (%p4414_p3), %s404_s19, 4294966272  ;;  %s3566_s22 = scalar_lea.vmem [#allocation9], %s2259_s21  ;;  %p4415_p1 = pmov %p4412_p5 }
  0xb8   : > { %3218 = dma.done.wait (%p4415_p1), [#allocation11], 2048   ;;  %p4416_p6 = pmov %p4415_p1 }
  0xb9   : > { %s2263_s26 = sshll.u32 %s3557_s4, 7  ;;  %p4417_p4 = scmp.ne.s32.totalorder %s3337_s8, 0 }
  0xba   : > { %3220 = vsyncadd (%p4416_p6), [#allocation11], 4294965248  ;;  %s3573_s15 = scalar_lea.vmem [#allocation13], %s2263_s26  ;;  %s3575_s11 = scalar_lea.vmem [#allocation14], %s2263_s26  ;;  %v476_v0 = vld [vmem:[#allocation4] sm:$0xff] (!%p4417_p4)  ;;  %v477_v1 = vld [vmem:[#allocation4 + $0x8] sm:$0xff] (!%p4417_p4) }
  0xbb   : > { %475 = sbr.rel (%p4417_p4) target bundleno = 195 (0xc3), region = 80  ;;  %v478_v2 = vld [vmem:[#allocation4 + $0x10] sm:$0xff] (!%p4417_p4)  ;;  %492 = vst [vmem:[#allocation2] sm:$0xff] (!%p4417_p4), %v476_v0  ;;  %493 = vst [vmem:[#allocation2 + $0x8] sm:$0xff] (!%p4417_p4), %v477_v1  ;;  %v479_v3 = vld [vmem:[#allocation4 + $0x18] sm:$0xff] (!%p4417_p4) }
  0xbc   : > { %494 = vst [vmem:[#allocation2 + $0x10] sm:$0xff] (!%p4417_p4), %v478_v2  ;;  %v480_v4 = vld [vmem:[#allocation4 + $0x20] sm:$0xff] (!%p4417_p4)  ;;  %v481_v5 = vld [vmem:[#allocation4 + $0x28] sm:$0xff] (!%p4417_p4)  ;;  %495 = vst [vmem:[#allocation2 + $0x18] sm:$0xff] (!%p4417_p4), %v479_v3 }
  0xbd   : > { %496 = vst [vmem:[#allocation2 + $0x20] sm:$0xff] (!%p4417_p4), %v480_v4  ;;  %497 = vst [vmem:[#allocation2 + $0x28] sm:$0xff] (!%p4417_p4), %v481_v5  ;;  %v482_v6 = vld [vmem:[#allocation4 + $0x30] sm:$0xff] (!%p4417_p4)  ;;  %v483_v7 = vld [vmem:[#allocation4 + $0x38] sm:$0xff] (!%p4417_p4) }
  0xbe   : > { %v484_v8 = vld [vmem:[#allocation4 + $0x40] sm:$0xff] (!%p4417_p4)  ;;  %498 = vst [vmem:[#allocation2 + $0x30] sm:$0xff] (!%p4417_p4), %v482_v6  ;;  %499 = vst [vmem:[#allocation2 + $0x38] sm:$0xff] (!%p4417_p4), %v483_v7  ;;  %v485_v9 = vld [vmem:[#allocation4 + $0x48] sm:$0xff] (!%p4417_p4) }
  0xbf   : > { %500 = vst [vmem:[#allocation2 + $0x40] sm:$0xff] (!%p4417_p4), %v484_v8  ;;  %v486_v10 = vld [vmem:[#allocation4 + $0x50] sm:$0xff] (!%p4417_p4)  ;;  %v487_v11 = vld [vmem:[#allocation4 + $0x58] sm:$0xff] (!%p4417_p4)  ;;  %501 = vst [vmem:[#allocation2 + $0x48] sm:$0xff] (!%p4417_p4), %v485_v9 }
  0xc0   : > { %502 = vst [vmem:[#allocation2 + $0x50] sm:$0xff] (!%p4417_p4), %v486_v10  ;;  %503 = vst [vmem:[#allocation2 + $0x58] sm:$0xff] (!%p4417_p4), %v487_v11  ;;  %v488_v12 = vld [vmem:[#allocation4 + $0x60] sm:$0xff] (!%p4417_p4)  ;;  %v489_v13 = vld [vmem:[#allocation4 + $0x68] sm:$0xff] (!%p4417_p4) }
  0xc1   : > { %v490_v14 = vld [vmem:[#allocation4 + $0x70] sm:$0xff] (!%p4417_p4)  ;;  %504 = vst [vmem:[#allocation2 + $0x60] sm:$0xff] (!%p4417_p4), %v488_v12  ;;  %505 = vst [vmem:[#allocation2 + $0x68] sm:$0xff] (!%p4417_p4), %v489_v13  ;;  %v491_v15 = vld [vmem:[#allocation4 + $0x78] sm:$0xff] (!%p4417_p4) }
  0xc2   : > { %506 = vst [vmem:[#allocation2 + $0x70] sm:$0xff] %v490_v14  ;;  %507 = vst [vmem:[#allocation2 + $0x78] sm:$0xff] %v491_v15 }
  0xc3 PF: > { %v3579_v16 = vld [vmem:[#allocation2] sm:$0xff]  ;;  %v3581_v17 = vld [vmem:[#allocation2 + $0x8] sm:$0xff]  ;;  %s4418_s27 = sld [smem:[#allocation28_spill]]  ;;  %vm607_vm0 = vcmask 523264   ;;  %v3632_v12 = vld [vmem:[%s3566_s22 + $0x10] sm:$0xff]   ;;  %s4419_s6 = sld [smem:[#allocation30_spill]] }
  0xc4   : > { %v524_v19 = vmax.f32 %v3579_v16, 0.0  ;;  %v525_v20 = vmax.f32 %v3581_v17, 0.0  ;;  %v3590_v21 = vld [vmem:[#allocation2 + $0x10] sm:$0xff]  ;;  %v3592_v22 = vld [vmem:[#allocation2 + $0x18] sm:$0xff]  ;;  %v2726_v46 = vld [vmem:[%s3566_s22] sm:$0xff]   ;;  %s4420_s25 = sld [smem:[#allocation31_spill]] }
  0xc5   : > { %v3594_v23 = vld [vmem:[#allocation2 + $0x20] sm:$0xff]  ;;  %v526_v24 = vmax.f32 %v3590_v21, 0.0  ;;  %v527_v25 = vmax.f32 %v3592_v22, 0.0  ;;  %v3598_v26 = vld [vmem:[#allocation2 + $0x28] sm:$0xff]  ;;  %2449 = vmatprep.mubr.msk.bf16.mxu1 %vm607_vm0, %v2726_v46  ;;  %v3638_v14 = vld [vmem:[%s3560_s1 + $0x10] sm:$0xff]   ;;  %s4421_s10 = sld [smem:[#allocation26_spill]] }
  0xc6   : > { %v528_v27 = vmax.f32 %v3594_v23, 0.0  ;;  %v529_v32 = vmax.f32 %v3598_v26, 0.0  ;;  %v3604_v34 = vld [vmem:[#allocation2 + $0x30] sm:$0xff]  ;;  %v3606_v35 = vld [vmem:[#allocation2 + $0x38] sm:$0xff]  ;;  %v2730_v3 = vld [vmem:[%s3560_s1] sm:$0xff]   ;;  %s2319_s17 = sshll.u32 %s3337_s8, 11 }
  0xc7   : > { %v516_v28 = vld [vmem:[#allocation2 + $0x40] sm:$0xff]  ;;  %v517_v29 = vld [vmem:[#allocation2 + $0x48] sm:$0xff]  ;;  %v530_v45 = vmax.f32 %v3604_v34, 0.0  ;;  %v531_v49 = vmax.f32 %v3606_v35, 0.0  ;;  %2433 = vmatprep.mubr.msk.bf16.mxu0 %vm607_vm0, %v2730_v3  ;;  %v3647_v15 = vld [vmem:[%s3566_s22 + $0x18] sm:$0xff]   ;;  %s4422_s13 = sld [smem:[#allocation33_spill]] }
  0xc8   : > { %v532_v33 = vmax.f32 %v516_v28, 0.0  ;;  %v518_v36 = vld [vmem:[#allocation2 + $0x50] sm:$0xff]  ;;  %v533_v40 = vmax.f32 %v517_v29, 0.0  ;;  %v519_v41 = vld [vmem:[#allocation2 + $0x58] sm:$0xff]  ;;  %v3629_v11 = vld [vmem:[%s3566_s22 + $0x8] sm:$0xff]   ;;  %s2089_s28 = sshll.u32 %s3575_s11, 4  ;;  %s4078_s28 = int_to_ptr.vmem [resolvable:$true] %s2089_s28 }
  0xc9   : > { %v3586_v18 = vld [vmem:[%s4418_s27] ss:$0 sm:$0xff]  ;;  %v534_v50 = vmax.f32 %v518_v36, 0.0  ;;  %v521_v52 = vld [vmem:[#allocation2 + $0x68] sm:$0xff]  ;;  %v535_v55 = vmax.f32 %v519_v41, 0.0  ;;  %v522_v57 = vld [vmem:[#allocation2 + $0x70] sm:$0xff] }
  0xca   : > { %v547_v30 = vadd.f32 %v3586_v18, %v524_v19  ;;  %v548_v31 = vadd.f32 %v3586_v18, %v525_v20  ;;  %v549_v37 = vadd.f32 %v3586_v18, %v526_v24  ;;  %v550_v38 = vadd.f32 %v3586_v18, %v527_v25  ;;  %v520_v51 = vld [vmem:[#allocation2 + $0x60] sm:$0xff]  ;;  %v523_v58 = vld [vmem:[#allocation2 + $0x78] sm:$0xff]  ;;  %v3635_v13 = vld [vmem:[%s3560_s1 + $0x8] sm:$0xff]   ;;  %s2060_s30 = scalar_lea.sflag [#allocation15], %s3557_s4  ;;  %s3137_s21 = scalar_lea.vmem %s4078_s28, 2048 }
  0xcb   : > { %v551_v39 = vadd.f32 %v3586_v18, %v528_v27  ;;  %v552_v43 = vadd.f32 %v3586_v18, %v529_v32  ;;  %v555_v44 = vadd.f32 %v3586_v18, %v532_v33  ;;  %v556_v48 = vadd.f32 %v3586_v18, %v533_v40  ;;  %p3138_p8 = scmp.ne.s32.totalorder %s4078_s28, %s3137_s21  ;;  %p4423_p11 = scmp.ne.s32.totalorder %s4421_s10, 0 }
  0xcc   : > { %v563_v42 = vpack.c.bf16 %v548_v31, %v547_v30  ;;  %v564_v47 = vpack.c.bf16 %v550_v38, %v549_v37  ;;  %v553_v54 = vadd.f32 %v3586_v18, %v530_v45  ;;  %v536_v56 = vmax.f32 %v520_v51, 0.0  ;;  %s3254_s19 = smov [#allocation14]  }
  0xcd   : > { %v565_v53 = vpack.c.bf16 %v552_v43, %v551_v39  ;;  %v567_v59 = vpack.c.bf16 %v556_v48, %v555_v44  ;;  %v554_v60 = vadd.f32 %v3586_v18, %v531_v49  ;;  %v557_v61 = vadd.f32 %v3586_v18, %v534_v50  ;;  %s4075_s29 = scalar_lea.hbm %s4422_s13, %s2319_s17  ;;  %p3139_p0 = pnand %p3138_p8, %p4423_p11 }
  0xce   : > { %2441 = vmatprep.subr.bf16.mxu1 %v563_v42  ;;  %v537_v62 = vmax.f32 %v521_v52, 0.0  ;;  %v558_v63 = vadd.f32 %v3586_v18, %v535_v55  ;;  %v559_v0 = vadd.f32 %v3586_v18, %v536_v56  ;;  %v538_v1 = vmax.f32 %v522_v57, 0.0 }
  0xcf   : > { %2442 = vmatpush3.bf16.msra.mxu1 %v563_v42  ;;  %v539_v2 = vmax.f32 %v523_v58, 0.0  ;;  %2425 = vmatprep.subr.bf16.mxu0 %v567_v59  ;;  %v566_v9 = vpack.c.bf16 %v554_v60, %v553_v54  ;;  %p3140_p9 = pneg %p3139_p0 }
  0xd0   : > { %2443 = vmatprep.subr.bf16.mxu1 %v564_v47  ;;  %v560_v4 = vadd.f32 %v3586_v18, %v537_v62  ;;  %2426 = vmatpush3.bf16.msra.mxu0 %v567_v59  ;;  %v568_v5 = vpack.c.bf16 %v558_v63, %v557_v61  ;;  %v561_v7 = vadd.f32 %v3586_v18, %v538_v1  ;;  %v3736_v1 = vld [vmem:[#allocation12] sm:$0xff]  }
  0xd1   : > { %v562_v8 = vadd.f32 %v3586_v18, %v539_v2  ;;  %v3652_v18 = vld [vmem:[%s3560_s1 + $0x18] sm:$0xff]   ;;  %v3738_v2 = vld [vmem:[#allocation12 + $0x8] sm:$0xff]   ;;  %s3141_s1 = sshll.u32 %s3254_s19, 4  ;;  %s3142_s1 = int_to_ptr.vmem [resolvable:$false] %s3141_s1 }
  0xd2   : > { %v569_v6 = vpack.c.bf16 %v560_v4, %v559_v0  ;;  %2427 = vmatprep.subr.bf16.mxu0 %v568_v5  ;;  %v3743_v4 = vld [vmem:[#allocation10 + $0x8] sm:$0xff]   ;;  %s3143_s22 = scalar_lea.vmem %s3142_s1, 4096  ;;  %p3144_p12 = scmp.lt.s32.totalorder %s4078_s28, %s3142_s1 }
  0xd3   : > { %2444 = vmatpush3.bf16.msra.mxu1 %v564_v47  ;;  %v570_v10 = vpack.c.bf16 %v562_v8, %v561_v7  ;;  %v3756_v7 = vld [vmem:[#allocation12 + $0x18] sm:$0xff]   ;;  %v3762_v8 = vld [vmem:[#allocation12 + $0x20] sm:$0xff]   ;;  %p3145_p7 = scmp.lt.s32.totalorder %s3143_s22, %s3137_s21 }
  0xd4   : > { %2445 = vmatprep.subr.bf16.mxu1 %v565_v53  ;;  %2428 = vmatpush3.bf16.msra.mxu0 %v568_v5  ;;  %v3747_v5 = vld [vmem:[#allocation12 + $0x10] sm:$0xff]  }
  0xd5   : > { %2429 = vmatprep.subr.bf16.mxu0 %v569_v6  ;;  %p3146_p2 = por %p3145_p7, %p3144_p12 }
  0xd7   : > { %2446 = vmatpush3.bf16.msra.mxu1 %v565_v53  ;;  %p3147_p10 = pnand %p3146_p2, %p3140_p9 }
  0xd8   : > { %2447 = vmatprep.subr.bf16.mxu1 %v566_v9  ;;  %2430 = vmatpush3.bf16.msra.mxu0 %v569_v6  ;;  %v3752_v6 = vld [vmem:[#allocation10 + $0x10] sm:$0xff]  }
  0xd9   : > { %2431 = vmatprep.subr.bf16.mxu0 %v570_v10 }
  0xdb   : > { %2448 = vmatpush3.bf16.msra.mxu1 %v566_v9  ;;  %v3767_v9 = vld [vmem:[#allocation12 + $0x28] sm:$0xff]  }
  0xdc   : > { %2432 = vmatpush3.bf16.msra.mxu0 %v570_v10  ;;  %v3771_v10 = vld [vmem:[#allocation12 + $0x30] sm:$0xff]  }
  0xde   : > { %2450 = vmatmul.mubr.msk.bf16.vlgmr.msra.gmra.mrb[0].mxu1 %vm607_vm0, %v3629_v11 }
  0xdf   : > { %2453 = vmatprep.mubr.msk.bf16.mxu1 %vm607_vm0, %v3632_v12  ;;  %2434 = vmatmul.mubr.msk.bf16.vlgmr.msra.gmra.mrb[0].mxu0 %vm607_vm0, %v3635_v13 }
  0xe0   : > { %2437 = vmatprep.mubr.msk.bf16.mxu0 %vm607_vm0, %v3638_v14 }
  0xe6   : > { %2454 = vmatmul.mubr.msk.bf16.gmra.mrb[4].mxu1 %vm607_vm0, %v3647_v15 }
  0xe7   : > { %2481 = vmatprep.mubr.msk.bf16.mxu1 %vm607_vm0, %v2726_v46  ;;  %2438 = vmatmul.mubr.msk.bf16.gmra.mrb[4].mxu0 %vm607_vm0, %v3652_v18 }
  0xe8   : > { %2465 = vmatprep.mubr.msk.bf16.mxu0 %vm607_vm0, %v2730_v3  ;;  %v3741_v3 = vld [vmem:[#allocation10] sm:$0xff]  }
 0x1b1   : > { %v2451_v19 = vpop.f32.mrb[0].mxu1 }
 0x1b2   : > { %792 = vst [vmem:[%s3575_s11 + $0x50] sm:$0xff] %v2451_v19  ;;  %v751_v20 = vpop.f32.mrb[1].mxu1  ;;  %v2435_v28 = vpop.f32.mrb[0].mxu0 }
 0x1b3   : > { %790 = vst [vmem:[%s3575_s11 + $0x40] sm:$0xff] %v751_v20  ;;  %v2452_v24 = vpop.f32.mrb[2].mxu1  ;;  %784 = vst [vmem:[%s3575_s11 + $0x10] sm:$0xff] %v2435_v28  ;;  %v654_v30 = vpop.f32.mrb[1].mxu0 }
 0x1b4   : > { %793 = vst [vmem:[%s3575_s11 + $0x58] sm:$0xff] %v2452_v24  ;;  %v799_v25 = vpack.c.bf16 %v2452_v24, %v2451_v19  ;;  %v754_v27 = vpop.f32.mrb[3].mxu1  ;;  %782 = vst [vmem:[%s3575_s11] sm:$0xff] %v654_v30  ;;  %v2436_v31 = vpop.f32.mrb[2].mxu0 }
 0x1b5   : > { %791 = vst [vmem:[%s3575_s11 + $0x48] sm:$0xff] %v754_v27  ;;  %v798_v29 = vpack.c.bf16 %v754_v27, %v751_v20  ;;  %785 = vst [vmem:[%s3575_s11 + $0x18] sm:$0xff] %v2436_v31  ;;  %v868_v32 = vpack.c.bf16 %v2436_v31, %v2435_v28  ;;  %v657_v33 = vpop.f32.mrb[3].mxu0 }
 0x1b6   : > { %783 = vst [vmem:[%s3575_s11 + $0x8] sm:$0xff] %v657_v33  ;;  %v867_v36 = vpack.c.bf16 %v657_v33, %v654_v30 }
 0x1b7   : > { %2457 = vmatprep.subr.bf16.mxu0 %v798_v29 }
 0x1b8   : > { %2458 = vmatpush3.bf16.msra.mxu0 %v798_v29  ;;  %2473 = vmatprep.subr.bf16.mxu1 %v867_v36 }
 0x1b9   : > { %v2455_v37 = vpop.f32.mrb[4].mxu1  ;;  %2459 = vmatprep.subr.bf16.mxu0 %v799_v25  ;;  %2474 = vmatpush3.bf16.msra.mxu1 %v867_v36 }
 0x1ba   : > { %796 = vst [vmem:[%s3575_s11 + $0x70] sm:$0xff] %v2455_v37  ;;  %v767_v38 = vpop.f32.mrb[5].mxu1  ;;  %v2439_v42 = vpop.f32.mrb[4].mxu0  ;;  %2475 = vmatprep.subr.bf16.mxu1 %v868_v32 }
 0x1bb   : > { %794 = vst [vmem:[%s3575_s11 + $0x60] sm:$0xff] %v767_v38  ;;  %v2456_v39 = vpop.f32.mrb[6].mxu1  ;;  %788 = vst [vmem:[%s3575_s11 + $0x30] sm:$0xff] %v2439_v42  ;;  %v670_v44 = vpop.f32.mrb[5].mxu0 }
 0x1bc   : > { %797 = vst [vmem:[%s3575_s11 + $0x78] sm:$0xff] %v2456_v39  ;;  %v801_v40 = vpack.c.bf16 %v2456_v39, %v2455_v37  ;;  %v770_v41 = vpop.f32.mrb[7].mxu1  ;;  %2460 = vmatpush3.bf16.msra.mxu0 %v799_v25  ;;  %786 = vst [vmem:[%s3575_s11 + $0x20] sm:$0xff] %v670_v44  ;;  %v2440_v45 = vpop.f32.mrb[6].mxu0 }
 0x1bd   : > { %795 = vst [vmem:[%s3575_s11 + $0x68] sm:$0xff] %v770_v41  ;;  %v800_v43 = vpack.c.bf16 %v770_v41, %v767_v38  ;;  %789 = vst [vmem:[%s3575_s11 + $0x38] sm:$0xff] %v2440_v45  ;;  %v870_v46 = vpack.c.bf16 %v2440_v45, %v2439_v42  ;;  %v673_v47 = vpop.f32.mrb[7].mxu0  ;;  %2476 = vmatpush3.bf16.msra.mxu1 %v868_v32 }
 0x1be   : > { %787 = vst [vmem:[%s3575_s11 + $0x28] sm:$0xff] %v673_v47  ;;  %v869_v48 = vpack.c.bf16 %v673_v47, %v670_v44 }
 0x1bf   : > { %2461 = vmatprep.subr.bf16.mxu0 %v800_v43 }
 0x1c0   : > { %2462 = vmatpush3.bf16.msra.mxu0 %v800_v43  ;;  %2477 = vmatprep.subr.bf16.mxu1 %v869_v48 }
 0x1c1   : > { %2463 = vmatprep.subr.bf16.mxu0 %v801_v40  ;;  %2478 = vmatpush3.bf16.msra.mxu1 %v869_v48 }
 0x1c2   : > { %2479 = vmatprep.subr.bf16.mxu1 %v870_v46 }
 0x1c4   : > { %2464 = vmatpush3.bf16.msra.mxu0 %v801_v40 }
 0x1c5   : > { %2480 = vmatpush3.bf16.msra.mxu1 %v870_v46  ;;  %2489 = vmatprep.subr.bf16.mxu0 %v3741_v3 }
 0x1c6   : > { %2513 = vmatprep.subr.bf16.mxu1 %v3736_v1 }
 0x1c7   : > { %2466 = vmatmul.mubr.msk.bf16.vlgmr.msra.gmra.mrb[8].mxu0 %vm607_vm0, %v3635_v13 }
 0x1c8   : > { %2469 = vmatprep.mubr.msk.bf16.mxu0 %vm607_vm0, %v3638_v14  ;;  %2482 = vmatmul.mubr.msk.bf16.vlgmr.msra.gmra.mrb[8].mxu1 %vm607_vm0, %v3629_v11  ;;  %v3775_v11 = vld [vmem:[#allocation12 + $0x38] sm:$0xff]  }
 0x1c9   : > { %2485 = vmatprep.mubr.msk.bf16.mxu1 %vm607_vm0, %v3632_v12  ;;  %2514 = vmatpush3.bf16.msra.mxu1 %v3736_v1 }
 0x1ca   : > { %2515 = vmatprep.subr.bf16.mxu1 %v3738_v2  ;;  %2490 = vmatpush3.bf16.msra.mxu0 %v3741_v3 }
 0x1cb   : > { %2491 = vmatprep.subr.bf16.mxu0 %v3743_v4 }
 0x1cd   : > { %2516 = vmatpush3.bf16.msra.mxu1 %v3738_v2 }
 0x1ce   : > { %2517 = vmatprep.subr.bf16.mxu1 %v3747_v5  ;;  %2492 = vmatpush3.bf16.msra.mxu0 %v3743_v4 }
 0x1cf   : > { %2470 = vmatmul.mubr.msk.bf16.gmra.mrb[12].mxu0 %vm607_vm0, %v3652_v18  ;;  %2493 = vmatprep.subr.bf16.mxu0 %v3752_v6 }
 0x1d0   : > { %2486 = vmatmul.mubr.msk.bf16.gmra.mrb[12].mxu1 %vm607_vm0, %v3647_v15 }
 0x1d1   : > { %2518 = vmatpush3.bf16.msra.mxu1 %v3747_v5 }
 0x1d2   : > { %2519 = vmatprep.subr.bf16.mxu1 %v3756_v7  ;;  %2494 = vmatpush3.bf16.msra.mxu0 %v3752_v6 }
 0x1d5   : > { %2520 = vmatpush3.bf16.msra.mxu1 %v3756_v7 }
 0x1d6   : > { %2521 = vmatprep.subr.bf16.mxu1 %v3762_v8 }
 0x1d9   : > { %2522 = vmatpush3.bf16.msra.mxu1 %v3762_v8 }
 0x1da   : > { %2523 = vmatprep.subr.bf16.mxu1 %v3767_v9 }
 0x1dd   : > { %2524 = vmatpush3.bf16.msra.mxu1 %v3767_v9 }
 0x1de   : > { %2525 = vmatprep.subr.bf16.mxu1 %v3771_v10 }
 0x1e1   : > { %2526 = vmatpush3.bf16.msra.mxu1 %v3771_v10 }
 0x1e2   : > { %2527 = vmatprep.subr.bf16.mxu1 %v3775_v11 }
 0x1e5   : > { %2528 = vmatpush3.bf16.msra.mxu1 %v3775_v11 }
 0x1e6   : > { %2561 = vmatprep.subr.bf16.mxu1 %v3741_v3 }
 0x29a   : > { %v3688_v49 = vpop.f32.mrb[8].mxu0 }
 0x29b   : > { %975 = vmax.xlane.f32.xlu1 %v3688_v49  ;;  %v3691_v50 = vpop.f32.mrb[9].mxu0  ;;  %v3698_v53 = vpop.f32.mrb[8].mxu1 }
 0x29c   : > { %971 = vmax.xlane.f32.xlu0 %v3691_v50  ;;  %v3694_v51 = vpop.f32.mrb[10].mxu0  ;;  %v3700_v54 = vpop.f32.mrb[9].mxu1 }
 0x29d   : > { %v3696_v52 = vpop.f32.mrb[11].mxu0  ;;  %v3703_v55 = vpop.f32.mrb[10].mxu1 }
 0x29e   : > { %v3706_v56 = vpop.f32.mrb[11].mxu1 }
 0x29f   : > { %977 = vmax.xlane.f32.xlu1 %v3694_v51 }
 0x2a0   : > { %973 = vmax.xlane.f32.xlu0 %v3696_v52 }
 0x2a2   : > { %v3708_v57 = vpop.f32.mrb[12].mxu0 }
 0x2a3   : > { %v3710_v58 = vpop.f32.mrb[13].mxu0  ;;  %v3717_v61 = vpop.f32.mrb[12].mxu1 }
 0x2a4   : > { %979 = vmax.xlane.f32.xlu0 %v3710_v58  ;;  %v3713_v59 = vpop.f32.mrb[14].mxu0  ;;  %v3720_v62 = vpop.f32.mrb[13].mxu1 }
 0x2a5   : > { %v3715_v60 = vpop.f32.mrb[15].mxu0  ;;  %v3722_v63 = vpop.f32.mrb[14].mxu1 }
 0x2a6   : > { %981 = vmax.xlane.f32.xlu1 %v3715_v60  ;;  %v3725_v0 = vpop.f32.mrb[15].mxu1 }
 0x2a8   : > { %983 = vmax.xlane.f32.xlu0 %v3708_v57 }
 0x2aa   : > { %985 = vmax.xlane.f32.xlu1 %v3713_v59 }
 0x2ac   : > { %1551 = vmax.xlane.f32.xlu0 %v3700_v54 }
 0x2ae   : > { %1553 = vmax.xlane.f32.xlu1 %v3706_v56 }
 0x2b0   : > { %1555 = vmax.xlane.f32.xlu0 %v3698_v53 }
 0x2b2   : > { %1557 = vmax.xlane.f32.xlu1 %v3703_v55 }
 0x2b4   : > { %1559 = vmax.xlane.f32.xlu0 %v3720_v62 }
 0x2b6   : > { %1561 = vmax.xlane.f32.xlu1 %v3725_v0 }
 0x2b8   : > { %1563 = vmax.xlane.f32.xlu0 %v3717_v61 }
 0x2ba   : > { %1565 = vmax.xlane.f32.xlu1 %v3722_v63 }
 0x328   : > { %v976_v12 = vpop.xlane.xlu1 %975 }
 0x329   : > { %v989_v13 = vsub.f32 %v3688_v49, %v976_v12  ;;  %v972_v14 = vpop.xlane.xlu0 %971 }
 0x32a   : > { %v987_v15 = vsub.f32 %v3691_v50, %v972_v14 }
 0x32b   : > { %v999_v20 = vmul.f32 1.442695, %v989_v13 }
 0x32c   : > { %v995_v18 = vmul.f32 1.442695, %v987_v15  ;;  %v978_v19 = vpop.xlane.xlu1 %977 }
 0x32d   : > { %v990_v24 = vsub.f32 %v3694_v51, %v978_v19  ;;  %v974_v25 = vpop.xlane.xlu0 %973 }
 0x32e   : > { %2750 = vpow2.f32 %v995_v18  ;;  %v988_v27 = vsub.f32 %v3696_v52, %v974_v25  ;;  %v1160_v25 = vpack.c.bf16 %v3581_v17, %v3579_v16 }
 0x32f   : > { %2752 = vpow2.f32 %v999_v20  ;;  %v1001_v29 = vmul.f32 1.442695, %v990_v24 }
 0x330   : > { %v997_v28 = vmul.f32 1.442695, %v988_v27  ;;  %2529 = vmatprep.mubr.bf16.mxu1 %v1160_v25 }
 0x331   : > { %v980_v30 = vpop.xlane.xlu0 %979 }
 0x332   : > { %2754 = vpow2.f32 %v997_v28  ;;  %v991_v31 = vsub.f32 %v3710_v58, %v980_v30  ;;  %v1161_v28 = vpack.c.bf16 %v3592_v22, %v3590_v21  ;;  %v2746_v22 = vld [vmem:[#allocation10 + $0x20] sm:$0xff]  }
 0x333   : > { %v982_v32 = vpop.xlane.xlu1 %981  ;;  %2756 = vpow2.f32 %v1001_v29 }
 0x334   : > { %v1003_v33 = vmul.f32 1.442695, %v991_v31  ;;  %v992_v36 = vsub.f32 %v3715_v60, %v982_v32  ;;  %2530 = vmatmul.mubr.bf16.vlgmr.msra.gmra.mrb[16].mxu1 %v1161_v28 }
 0x335   : > { %v984_v37 = vpop.xlane.xlu0 %983  ;;  %2562 = vmatpush3.bf16.msra.mxu1 %v3741_v3  ;;  %v2747_v3 = vld [vmem:[#allocation10 + $0x28] sm:$0xff]  }
 0x336   : > { %2758 = vpow2.f32 %v1003_v33  ;;  %v1005_v38 = vmul.f32 1.442695, %v992_v36  ;;  %v993_v39 = vsub.f32 %v3708_v57, %v984_v37  ;;  %2563 = vmatprep.subr.bf16.mxu1 %v3743_v4  ;;  %v2748_v37 = vld [vmem:[#allocation10 + $0x30] sm:$0xff]  }
 0x337   : > { %v986_v40 = vpop.xlane.xlu1 %985 }
 0x338   : > { %v3788_v41 = vpop.eup %2750  ;;  %v1007_v42 = vmul.f32 1.442695, %v993_v39  ;;  %v994_v43 = vsub.f32 %v3713_v59, %v986_v40  ;;  %2760 = vpow2.f32 %v1005_v38  ;;  %v1162_v39 = vpack.c.bf16 %v3598_v26, %v3594_v23 }
 0x339   : > { %1011 = vadd.xlane.f32.xlu0 %v3788_v41  ;;  %v1552_v44 = vpop.xlane.xlu0 %1551  ;;  %v3793_v47 = vpop.eup %2752  ;;  %2564 = vmatpush3.bf16.msra.mxu1 %v3743_v4  ;;  %v1163_v40 = vpack.c.bf16 %v3606_v35, %v3604_v34 }
 0x33a   : > { %2762 = vpow2.f32 %v1007_v42  ;;  %v1009_v45 = vmul.f32 1.442695, %v994_v43  ;;  %v1567_v46 = vsub.f32 %v3700_v54, %v1552_v44  ;;  %2565 = vmatprep.subr.bf16.mxu1 %v3752_v6  ;;  %2533 = vmatprep.mubr.bf16.mxu1 %v1162_v39 }
 0x33b   : > { %v1554_v48 = vpop.xlane.xlu1 %1553 }
 0x33c   : > { %v3795_v49 = vpop.eup %2754  ;;  %v1575_v50 = vmul.f32 1.442695, %v1567_v46  ;;  %v1568_v51 = vsub.f32 %v3706_v56, %v1554_v48  ;;  %2764 = vpow2.f32 %v1009_v45  ;;  %2534 = vmatmul.mubr.bf16.gmra.mrb[20].mxu1 %v1163_v40 }
 0x33d   : > { %1015 = vadd.xlane.f32.xlu0 %v3793_v47  ;;  %v1556_v52 = vpop.xlane.xlu0 %1555  ;;  %1013 = vadd.xlane.f32.xlu1 %v3795_v49  ;;  %v3801_v59 = vpop.eup %2756 }
 0x33e   : > { %2766 = vpow2.f32 %v1575_v50  ;;  %v1577_v57 = vmul.f32 1.442695, %v1568_v51  ;;  %v1569_v58 = vsub.f32 %v3698_v53, %v1556_v52  ;;  %2566 = vmatpush3.bf16.msra.mxu1 %v3752_v6  ;;  %v2749_v6 = vld [vmem:[#allocation10 + $0x38] sm:$0xff]  }
 0x33f   : > { %v1558_v54 = vpop.xlane.xlu1 %1557 }
 0x340   : > { %v3803_v60 = vpop.eup %2758  ;;  %v1579_v12 = vmul.f32 1.442695, %v1569_v58  ;;  %v1570_v13 = vsub.f32 %v3703_v55, %v1558_v54  ;;  %2768 = vpow2.f32 %v1577_v57 }
 0x341   : > { %1019 = vadd.xlane.f32.xlu0 %v3803_v60  ;;  %v1560_v56 = vpop.xlane.xlu0 %1559  ;;  %1017 = vadd.xlane.f32.xlu1 %v3801_v59 }
 0x342   : > { %2770 = vpow2.f32 %v1579_v12  ;;  %v1581_v14 = vmul.f32 1.442695, %v1570_v13  ;;  %v1571_v15 = vsub.f32 %v3720_v62, %v1560_v56  ;;  %v3809_v18 = vpop.eup %2760 }
 0x343   : > { %v1562_v53 = vpop.xlane.xlu1 %1561 }
 0x344   : > { %v3811_v19 = vpop.eup %2762  ;;  %v1583_v20 = vmul.f32 1.442695, %v1571_v15  ;;  %v1572_v24 = vsub.f32 %v3725_v0, %v1562_v53  ;;  %2772 = vpow2.f32 %v1581_v14  ;;  %v2745_v0 = vld [vmem:[#allocation10 + $0x18] sm:$0xff]  }
 0x345   : > { %1023 = vadd.xlane.f32.xlu0 %v3811_v19  ;;  %v1564_v55 = vpop.xlane.xlu0 %1563  ;;  %1021 = vadd.xlane.f32.xlu1 %v3809_v18 }
 0x346   : > { %2774 = vpow2.f32 %v1583_v20  ;;  %v1585_v27 = vmul.f32 1.442695, %v1572_v24  ;;  %v1573_v62 = vsub.f32 %v3717_v61, %v1564_v55  ;;  %v3821_v29 = vpop.eup %2764  ;;  %2495 = vmatprep.subr.bf16.mxu0 %v2745_v0  ;;  %2567 = vmatprep.subr.bf16.mxu1 %v2745_v0 }
 0x347   : > { %v1566_v30 = vpop.xlane.xlu1 %1565  ;;  %2496 = vmatpush3.bf16.msra.mxu0 %v2745_v0  ;;  %2568 = vmatpush3.bf16.msra.mxu1 %v2745_v0 }
 0x348   : > { %v3823_v31 = vpop.eup %2766  ;;  %v1587_v32 = vmul.f32 1.442695, %v1573_v62  ;;  %v1574_v33 = vsub.f32 %v3722_v63, %v1566_v30  ;;  %2776 = vpow2.f32 %v1585_v27  ;;  %2497 = vmatprep.subr.bf16.mxu0 %v2746_v22  ;;  %2569 = vmatprep.subr.bf16.mxu1 %v2746_v22 }
 0x349   : > { %1591 = vadd.xlane.f32.xlu0 %v3823_v31  ;;  %1025 = vadd.xlane.f32.xlu1 %v3821_v29 }
 0x34a   : > { %2778 = vpow2.f32 %v1587_v32  ;;  %v1589_v16 = vmul.f32 1.442695, %v1574_v33  ;;  %v3829_v17 = vpop.eup %2768 }
 0x34b   : > { %2498 = vmatpush3.bf16.msra.mxu0 %v2746_v22  ;;  %2570 = vmatpush3.bf16.msra.mxu1 %v2746_v22 }
 0x34c   : > { %v3832_v21 = vpop.eup %2770  ;;  %2780 = vpow2.f32 %v1589_v16  ;;  %2499 = vmatprep.subr.bf16.mxu0 %v2747_v3  ;;  %2571 = vmatprep.subr.bf16.mxu1 %v2747_v3 }
 0x34d   : > { %1595 = vadd.xlane.f32.xlu0 %v3832_v21  ;;  %1593 = vadd.xlane.f32.xlu1 %v3829_v17 }
 0x34e   : > { %v3837_v61 = vpop.eup %2772 }
 0x34f   : > { %2500 = vmatpush3.bf16.msra.mxu0 %v2747_v3  ;;  %2572 = vmatpush3.bf16.msra.mxu1 %v2747_v3 }
 0x350   : > { %v3840_v63 = vpop.eup %2774  ;;  %2501 = vmatprep.subr.bf16.mxu0 %v2748_v37  ;;  %2573 = vmatprep.subr.bf16.mxu1 %v2748_v37 }
 0x351   : > { %1599 = vadd.xlane.f32.xlu0 %v3840_v63  ;;  %1597 = vadd.xlane.f32.xlu1 %v3837_v61 }
 0x352   : > { %v3845_v36 = vpop.eup %2776 }
 0x353   : > { %2502 = vmatpush3.bf16.msra.mxu0 %v2748_v37  ;;  %2574 = vmatpush3.bf16.msra.mxu1 %v2748_v37 }
 0x354   : > { %v3847_v4 = vpop.eup %2778  ;;  %2503 = vmatprep.subr.bf16.mxu0 %v2749_v6  ;;  %2575 = vmatprep.subr.bf16.mxu1 %v2749_v6 }
 0x355   : > { %1603 = vadd.xlane.f32.xlu0 %v3847_v4  ;;  %1601 = vadd.xlane.f32.xlu1 %v3845_v36 }
 0x356   : > { %v3851_v38 = vpop.eup %2780 }
 0x357   : > { %2504 = vmatpush3.bf16.msra.mxu0 %v2749_v6  ;;  %2576 = vmatpush3.bf16.msra.mxu1 %v2749_v6 }
 0x358   : > { %2537 = vmatprep.subr.bf16.mxu0 %v3736_v1  ;;  %2609 = vmatprep.subr.bf16.mxu1 %v3736_v1 }
 0x359   : > { %1605 = vadd.xlane.f32.xlu1 %v3851_v38 }
 0x3c6   : > { %v1012_v42 = vpop.xlane.xlu0 %1011 }
 0x3c7   : > { %2782 = vrcp.f32 %v1012_v42 }
 0x3ca   : > { %v1016_v43 = vpop.xlane.xlu0 %1015  ;;  %v1014_v44 = vpop.xlane.xlu1 %1013 }
 0x3cb   : > { %2784 = vrcp.f32 %v1014_v44 }
 0x3cc   : > { %2786 = vrcp.f32 %v1016_v43 }
 0x3ce   : > { %v1020_v23 = vpop.xlane.xlu0 %1019  ;;  %v1018_v26 = vpop.xlane.xlu1 %1017 }
 0x3cf   : > { %2788 = vrcp.f32 %v1018_v26 }
 0x3d0   : > { %2790 = vrcp.f32 %v1020_v23 }
 0x3d1   : > { %v2783_v45 = vpop.eup %2782 }
 0x3d2   : > { %v1024_v34 = vpop.xlane.xlu0 %1023  ;;  %v1022_v35 = vpop.xlane.xlu1 %1021  ;;  %v1035_v51 = vmul.f32 %v2783_v45, %v3788_v41 }
 0x3d3   : > { %2792 = vrcp.f32 %v1022_v35 }
 0x3d4   : > { %2794 = vrcp.f32 %v1024_v34 }
 0x3d5   : > { %v2785_v46 = vpop.eup %2784 }
 0x3d6   : > { %v1592_v48 = vpop.xlane.xlu0 %1591  ;;  %v1026_v50 = vpop.xlane.xlu1 %1025  ;;  %v1036_v52 = vmul.f32 %v2785_v46, %v3795_v49 }
 0x3d7   : > { %v2787_v57 = vpop.eup %2786  ;;  %2796 = vrcp.f32 %v1026_v50 }
 0x3d8   : > { %v1043_v58 = vpack.c.bf16 %v1036_v52, %v1035_v51  ;;  %2798 = vrcp.f32 %v1592_v48  ;;  %v1037_v56 = vmul.f32 %v2787_v57, %v3793_v47  ;;  %v3919_v48 = vld [vmem:[%s4420_s25] ss:$0 sm:$0xff] }
 0x3d9   : > { %v2789_v54 = vpop.eup %2788 }
 0x3da   : > { %v1596_v12 = vpop.xlane.xlu0 %1595  ;;  %v1594_v13 = vpop.xlane.xlu1 %1593  ;;  %v1038_v14 = vmul.f32 %v2789_v54, %v3801_v59  ;;  %2505 = vmatprep.mubr.bf16.mxu0 %v1043_v58 }
 0x3db   : > { %v2791_v15 = vpop.eup %2790  ;;  %2800 = vrcp.f32 %v1594_v13 }
 0x3dc   : > { %v1044_v53 = vpack.c.bf16 %v1038_v14, %v1037_v56  ;;  %2802 = vrcp.f32 %v1596_v12  ;;  %v1039_v49 = vmul.f32 %v2791_v15, %v3803_v60 }
 0x3dd   : > { %v2793_v20 = vpop.eup %2792 }
 0x3de   : > { %v1600_v41 = vpop.xlane.xlu0 %1599  ;;  %v1598_v24 = vpop.xlane.xlu1 %1597  ;;  %2506 = vmatmul.mubr.bf16.vlgmr.msra.gmra.mrb[16].mxu0 %v1044_v53  ;;  %v1040_v55 = vmul.f32 %v2793_v20, %v3809_v18 }
 0x3df   : > { %v2795_v25 = vpop.eup %2794  ;;  %2804 = vrcp.f32 %v1598_v24  ;;  %2538 = vmatpush3.bf16.msra.mxu0 %v3736_v1 }
 0x3e0   : > { %v1045_v47 = vpack.c.bf16 %v1040_v55, %v1039_v49  ;;  %2539 = vmatprep.subr.bf16.mxu0 %v3738_v2  ;;  %2806 = vrcp.f32 %v1600_v41  ;;  %v1041_v28 = vmul.f32 %v2795_v25, %v3811_v19 }
 0x3e1   : > { %v2797_v59 = vpop.eup %2796 }
 0x3e2   : > { %v1604_v27 = vpop.xlane.xlu0 %1603  ;;  %v1602_v62 = vpop.xlane.xlu1 %1601  ;;  %2509 = vmatprep.mubr.bf16.mxu0 %v1045_v47  ;;  %v1042_v30 = vmul.f32 %v2797_v59, %v3821_v29 }
 0x3e3   : > { %v2799_v0 = vpop.eup %2798  ;;  %2808 = vrcp.f32 %v1602_v62  ;;  %2540 = vmatpush3.bf16.msra.mxu0 %v3738_v2 }
 0x3e4   : > { %2810 = vrcp.f32 %v1604_v27  ;;  %v1046_v60 = vpack.c.bf16 %v1042_v30, %v1041_v28  ;;  %2541 = vmatprep.subr.bf16.mxu0 %v3747_v5  ;;  %v1615_v33 = vmul.f32 %v2799_v0, %v3823_v31 }
 0x3e5   : > { %v2801_v18 = vpop.eup %2800 }
 0x3e6   : > { %v1606_v32 = vpop.xlane.xlu1 %1605  ;;  %2510 = vmatmul.mubr.bf16.gmra.mrb[20].mxu0 %v1046_v60  ;;  %v1616_v16 = vmul.f32 %v2801_v18, %v3829_v17  ;;  %v2803_v22 = vpop.eup %2802 }
 0x3e7   : > { %2812 = vrcp.f32 %v1606_v32  ;;  %2542 = vmatpush3.bf16.msra.mxu0 %v3747_v5  ;;  %v1617_v3 = vmul.f32 %v2803_v22, %v3832_v21 }
 0x3e8   : > { %v1623_v19 = vpack.c.bf16 %v1616_v16, %v1615_v33  ;;  %2543 = vmatprep.subr.bf16.mxu0 %v3756_v7 }
 0x3e9   : > { %v2805_v29 = vpop.eup %2804 }
 0x3ea   : > { %v1618_v37 = vmul.f32 %v2805_v29, %v3837_v61  ;;  %2577 = vmatprep.mubr.bf16.mxu1 %v1623_v19  ;;  %v2807_v6 = vpop.eup %2806 }
 0x3eb   : > { %2544 = vmatpush3.bf16.msra.mxu0 %v3756_v7  ;;  %v1619_v40 = vmul.f32 %v2807_v6, %v3840_v63  ;;  %v3910_v63 = vld [vmem:[%s4419_s6] ss:$0 sm:$0xff] }
 0x3ec   : > { %v1624_v39 = vpack.c.bf16 %v1618_v37, %v1617_v3  ;;  %2545 = vmatprep.subr.bf16.mxu0 %v3762_v8 }
 0x3ed   : > { %v2809_v31 = vpop.eup %2808 }
 0x3ee   : > { %v2811_v17 = vpop.eup %2810  ;;  %2578 = vmatmul.mubr.bf16.vlgmr.msra.gmra.mrb[24].mxu1 %v1624_v39  ;;  %v1620_v42 = vmul.f32 %v2809_v31, %v3845_v36  ;;  %v3960_v39 = vld [vmem:[#allocation2 + $0x40] sm:$0xff]  ;;  %v2975_v31 = vld [vmem:[#allocation2 + $0x48] sm:$0xff] }
 0x3ef   : > { %2546 = vmatpush3.bf16.msra.mxu0 %v3762_v8  ;;  %2610 = vmatpush3.bf16.msra.mxu1 %v3736_v1  ;;  %v1621_v43 = vmul.f32 %v2811_v17, %v3847_v4 }
 0x3f0   : > { %v1625_v61 = vpack.c.bf16 %v1620_v42, %v1619_v40  ;;  %2547 = vmatprep.subr.bf16.mxu0 %v3767_v9  ;;  %2611 = vmatprep.subr.bf16.mxu1 %v3738_v2 }
 0x3f1   : > { %v2813_v21 = vpop.eup %2812 }
 0x3f2   : > { %v1622_v44 = vmul.f32 %v2813_v21, %v3851_v38  ;;  %2581 = vmatprep.mubr.bf16.mxu1 %v1625_v61 }
 0x3f3   : > { %2548 = vmatpush3.bf16.msra.mxu0 %v3767_v9  ;;  %2612 = vmatpush3.bf16.msra.mxu1 %v3738_v2 }
 0x3f4   : > { %v1626_v23 = vpack.c.bf16 %v1622_v44, %v1621_v43  ;;  %2549 = vmatprep.subr.bf16.mxu0 %v3771_v10  ;;  %2613 = vmatprep.subr.bf16.mxu1 %v3747_v5 }
 0x3f6   : > { %2582 = vmatmul.mubr.bf16.gmra.mrb[28].mxu1 %v1626_v23 }
 0x3f7   : > { %2550 = vmatpush3.bf16.msra.mxu0 %v3771_v10  ;;  %2614 = vmatpush3.bf16.msra.mxu1 %v3747_v5 }
 0x3f8   : > { %2551 = vmatprep.subr.bf16.mxu0 %v3775_v11  ;;  %2615 = vmatprep.subr.bf16.mxu1 %v3756_v7 }
 0x3fb   : > { %2552 = vmatpush3.bf16.msra.mxu0 %v3775_v11  ;;  %2616 = vmatpush3.bf16.msra.mxu1 %v3756_v7 }
 0x3fc   : > { %2617 = vmatprep.subr.bf16.mxu1 %v3762_v8  ;;  %2585 = vmatprep.subr.bf16.mxu0 %v3736_v1 }
 0x3ff   : > { %2618 = vmatpush3.bf16.msra.mxu1 %v3762_v8 }
 0x400   : > { %2619 = vmatprep.subr.bf16.mxu1 %v3767_v9 }
 0x403   : > { %2620 = vmatpush3.bf16.msra.mxu1 %v3767_v9 }
 0x404   : > { %2621 = vmatprep.subr.bf16.mxu1 %v3771_v10 }
 0x407   : > { %2622 = vmatpush3.bf16.msra.mxu1 %v3771_v10  ;;  %v2531_v36 = vpop.f32.mrb[16].mxu1 }
 0x408   : > { %2623 = vmatprep.subr.bf16.mxu1 %v3775_v11  ;;  %v1252_v4 = vpop.f32.mrb[17].mxu1  ;;  %v1261_v35 = vadd.f32 %v2531_v36, %v3910_v63 }
 0x409   : > { %v1253_v38 = vadd.f32 %v3910_v63, %v1252_v4  ;;  %v2532_v26 = vpop.f32.mrb[18].mxu1  ;;  %v4000_v4 = vld [vmem:[#allocation2 + $0x58] sm:$0xff] }
 0x40a   : > { %v1255_v34 = vpop.f32.mrb[19].mxu1  ;;  %v1264_v46 = vadd.f32 %v2532_v26, %v3910_v63  ;;  %v4005_v26 = vld [vmem:[#allocation2 + $0x60] sm:$0xff] }
 0x40b   : > { %2624 = vmatpush3.bf16.msra.mxu1 %v3775_v11  ;;  %2814 = vtanh.f32 %v1253_v38  ;;  %v1256_v45 = vadd.f32 %v3910_v63, %v1255_v34 }
 0x40d   : > { %2816 = vtanh.f32 %v1256_v45 }
 0x40e   : > { %2818 = vtanh.f32 %v1261_v35  ;;  %v2981_v35 = vld [vmem:[#allocation2 + $0x78] sm:$0xff] }
 0x40f   : > { %2820 = vtanh.f32 %v1264_v46  ;;  %v2535_v56 = vpop.f32.mrb[20].mxu1 }
 0x410   : > { %v1268_v14 = vpop.f32.mrb[21].mxu1  ;;  %v1277_v15 = vadd.f32 %v2535_v56, %v3910_v63 }
 0x411   : > { %v2536_v53 = vpop.f32.mrb[22].mxu1  ;;  %v1269_v20 = vadd.f32 %v3910_v63, %v1268_v14 }
 0x412   : > { %v1271_v41 = vpop.f32.mrb[23].mxu1  ;;  %v1280_v24 = vadd.f32 %v2536_v53, %v3910_v63 }
 0x413   : > { %v1272_v49 = vadd.f32 %v3910_v63, %v1271_v41  ;;  %2822 = vtanh.f32 %v1269_v20 }
 0x414   : > { %2824 = vtanh.f32 %v1277_v15 }
 0x415   : > { %v2815_v50 = vpop.eup %2814  ;;  %2826 = vtanh.f32 %v1272_v49 }
 0x416   : > { %v1374_v51 = vmul.f32 %v2815_v50, %v3919_v48  ;;  %2828 = vtanh.f32 %v1280_v24 }
 0x417   : > { %v2817_v52 = vpop.eup %2816 }
 0x418   : > { %1382 = vadd.xlane.f32.xlu0 %v1374_v51  ;;  %v1375_v57 = vmul.f32 %v2817_v52, %v3919_v48  ;;  %v2819_v58 = vpop.eup %2818 }
 0x419   : > { %v2821_v54 = vpop.eup %2820  ;;  %v1376_v12 = vmul.f32 %v2819_v58, %v3919_v48 }
 0x41a   : > { %1384 = vadd.xlane.f32.xlu1 %v1375_v57  ;;  %v1377_v13 = vmul.f32 %v2821_v54, %v3919_v48 }
 0x41c   : > { %1386 = vadd.xlane.f32.xlu0 %v1376_v12 }
 0x41d   : > { %v2823_v55 = vpop.eup %2822 }
 0x41e   : > { %1388 = vadd.xlane.f32.xlu1 %v1377_v13  ;;  %v2825_v25 = vpop.eup %2824  ;;  %v1378_v59 = vmul.f32 %v2823_v55, %v3919_v48 }
 0x41f   : > { %v2827_v47 = vpop.eup %2826  ;;  %v1380_v28 = vmul.f32 %v2825_v25, %v3919_v48 }
 0x420   : > { %v2829_v27 = vpop.eup %2828  ;;  %v1379_v62 = vmul.f32 %v2827_v47, %v3919_v48  ;;  %1390 = vadd.xlane.f32.xlu0 %v1378_v59 }
 0x421   : > { %v1381_v30 = vmul.f32 %v2829_v27, %v3919_v48 }
 0x422   : > { %1392 = vadd.xlane.f32.xlu1 %v1379_v62 }
 0x424   : > { %1394 = vadd.xlane.f32.xlu0 %v1380_v28 }
 0x426   : > { %1396 = vadd.xlane.f32.xlu1 %v1381_v30 }
 0x4b1   : > { %v3933_v0 = vpop.f32.mrb[16].mxu0 }
 0x4b2   : > { %v3935_v60 = vpop.f32.mrb[17].mxu0 }
 0x4b3   : > { %v3937_v18 = vpop.f32.mrb[18].mxu0 }
 0x4b4   : > { %v1292_v32 = vpack.c.bf16 %v3937_v18, %v3933_v0  ;;  %v3941_v33 = vpop.f32.mrb[19].mxu0 }
 0x4b5   : > { %v1291_v16 = vpack.c.bf16 %v3941_v33, %v3935_v60 }
 0x4b7   : > { %2553 = vmatprep.mubr.bf16.mxu0 %v1291_v16 }
 0x4b8   : > { %2554 = vmatmul.mubr.bf16.vlgmr.msra.gmra.mrb[24].mxu0 %v1292_v32 }
 0x4b9   : > { %v3945_v22 = vpop.f32.mrb[20].mxu0  ;;  %2586 = vmatpush3.bf16.msra.mxu0 %v3736_v1  ;;  %v1692_v1 = vpack.c.bf16 %v2975_v31, %v3960_v39 }
 0x4ba   : > { %v3948_v19 = vpop.f32.mrb[21].mxu0  ;;  %2587 = vmatprep.subr.bf16.mxu0 %v3738_v2 }
 0x4bb   : > { %v3951_v29 = vpop.f32.mrb[22].mxu0 }
 0x4bc   : > { %v1294_v3 = vpack.c.bf16 %v3951_v29, %v3945_v22  ;;  %v3955_v37 = vpop.f32.mrb[23].mxu0 }
 0x4bd   : > { %v1293_v6 = vpack.c.bf16 %v3955_v37, %v3948_v19  ;;  %2588 = vmatpush3.bf16.msra.mxu0 %v3738_v2 }
 0x4be   : > { %2589 = vmatprep.subr.bf16.mxu0 %v3747_v5 }
 0x4bf   : > { %2557 = vmatprep.mubr.bf16.mxu0 %v1293_v6 }
 0x4c0   : > { %2558 = vmatmul.mubr.bf16.gmra.mrb[28].mxu0 %v1294_v3 }
 0x4c1   : > { %v3964_v17 = vpop.f32.mrb[24].mxu1  ;;  %2590 = vmatpush3.bf16.msra.mxu0 %v3747_v5  ;;  %2601 = vmatprep.mubr.bf16.mxu0 %v1692_v1 }
 0x4c2   : > { %v3967_v40 = vpop.f32.mrb[25].mxu1  ;;  %2591 = vmatprep.subr.bf16.mxu0 %v3756_v7 }
 0x4c3   : > { %v3970_v42 = vpop.f32.mrb[26].mxu1 }
 0x4c4   : > { %v1770_v2 = vpack.c.bf16 %v3970_v42, %v3964_v17  ;;  %v3974_v21 = vpop.f32.mrb[27].mxu1 }
 0x4c5   : > { %v1769_v61 = vpack.c.bf16 %v3974_v21, %v3967_v40  ;;  %2592 = vmatpush3.bf16.msra.mxu0 %v3756_v7 }
 0x4c6   : > { %2593 = vmatprep.subr.bf16.mxu0 %v3762_v8 }
 0x4c7   : > { %2625 = vmatprep.mubr.bf16.mxu1 %v1769_v61 }
 0x4c8   : > { %2626 = vmatmul.mubr.bf16.vlgmr.msra.gmra.mrb[32].mxu1 %v1770_v2 }
 0x4c9   : > { %v3980_v5 = vpop.f32.mrb[28].mxu1  ;;  %2594 = vmatpush3.bf16.msra.mxu0 %v3762_v8  ;;  %v3998_v8 = vld [vmem:[#allocation2 + $0x50] sm:$0xff] }
 0x4ca   : > { %v3983_v43 = vpop.f32.mrb[29].mxu1  ;;  %2595 = vmatprep.subr.bf16.mxu0 %v3767_v9  ;;  %v1693_v38 = vpack.c.bf16 %v4000_v4, %v3998_v8 }
 0x4cb   : > { %v3986_v44 = vpop.f32.mrb[30].mxu1 }
 0x4cc   : > { %v1772_v23 = vpack.c.bf16 %v3986_v44, %v3980_v5  ;;  %v3990_v36 = vpop.f32.mrb[31].mxu1 }
 0x4cd   : > { %v1771_v7 = vpack.c.bf16 %v3990_v36, %v3983_v43  ;;  %2596 = vmatpush3.bf16.msra.mxu0 %v3767_v9  ;;  %v4007_v9 = vld [vmem:[#allocation2 + $0x68] sm:$0xff] }
 0x4ce   : > { %2597 = vmatprep.subr.bf16.mxu0 %v3771_v10  ;;  %v1694_v34 = vpack.c.bf16 %v4007_v9, %v4005_v26 }
 0x4cf   : > { %2629 = vmatprep.mubr.bf16.mxu1 %v1771_v7 }
 0x4d0   : > { %2630 = vmatmul.mubr.bf16.gmra.mrb[36].mxu1 %v1772_v23 }
 0x4d1   : > { %2598 = vmatpush3.bf16.msra.mxu0 %v3771_v10  ;;  %v2980_v10 = vld [vmem:[#allocation2 + $0x70] sm:$0xff] }
 0x4d2   : > { %2599 = vmatprep.subr.bf16.mxu0 %v3775_v11  ;;  %v1695_v45 = vpack.c.bf16 %v2981_v35, %v2980_v10 }
 0x4d5   : > { %2600 = vmatpush3.bf16.msra.mxu0 %v3775_v11 }
 0x4d8   : > { %2602 = vmatmul.mubr.bf16.vlgmr.msra.gmra.mrb[32].mxu0 %v1693_v38 }
 0x4d9   : > { %2605 = vmatprep.mubr.bf16.mxu0 %v1694_v34 }
 0x4e0   : > { %2606 = vmatmul.mubr.bf16.gmra.mrb[36].mxu0 %v1695_v45 }
 0x58b   : > { %v2555_v46 = vpop.f32.mrb[24].mxu0 }
 0x58c   : > { %v1338_v50 = vadd.f32 %v2555_v46, %v3910_v63  ;;  %v1329_v51 = vpop.f32.mrb[25].mxu0 }
 0x58d   : > { %v2556_v52 = vpop.f32.mrb[26].mxu0  ;;  %v1330_v53 = vadd.f32 %v3910_v63, %v1329_v51 }
 0x58e   : > { %2830 = vtanh.f32 %v1338_v50  ;;  %v1341_v11 = vadd.f32 %v2556_v52, %v3910_v63  ;;  %v1332_v57 = vpop.f32.mrb[27].mxu0 }
 0x58f   : > { %v1333_v25 = vadd.f32 %v3910_v63, %v1332_v57 }
 0x590   : > { %2832 = vtanh.f32 %v1341_v11 }
 0x593   : > { %v2559_v58 = vpop.f32.mrb[28].mxu0 }
 0x594   : > { %v1345_v54 = vpop.f32.mrb[29].mxu0  ;;  %v1354_v30 = vadd.f32 %v2559_v58, %v3910_v63 }
 0x595   : > { %v2560_v12 = vpop.f32.mrb[30].mxu0  ;;  %v1346_v1 = vadd.f32 %v3910_v63, %v1345_v54 }
 0x596   : > { %v1348_v13 = vpop.f32.mrb[31].mxu0  ;;  %v1357_v3 = vadd.f32 %v2560_v12, %v3910_v63 }
 0x597   : > { %v1349_v7 = vadd.f32 %v3910_v63, %v1348_v13 }
 0x598   : > { %v2831_v56 = vpop.eup %2830 }
 0x599   : > { %v1409_v14 = vmul.f32 %v2831_v56, %v3919_v48 }
 0x59a   : > { %v2833_v15 = vpop.eup %2832 }
 0x59b   : > { %1419 = vadd.xlane.f32.xlu0 %v1409_v14  ;;  %v2627_v20 = vpop.f32.mrb[32].mxu1  ;;  %v1410_v41 = vmul.f32 %v2833_v15, %v3919_v48 }
 0x59c   : > { %v1816_v24 = vadd.f32 %v2627_v20, %v3910_v63  ;;  %v1807_v49 = vpop.f32.mrb[33].mxu1 }
 0x59d   : > { %1421 = vadd.xlane.f32.xlu1 %v1410_v41  ;;  %v2628_v55 = vpop.f32.mrb[34].mxu1  ;;  %v1808_v27 = vadd.f32 %v3910_v63, %v1807_v49 }
 0x59e   : > { %2834 = vtanh.f32 %v1816_v24  ;;  %v1819_v47 = vadd.f32 %v2628_v55, %v3910_v63  ;;  %v1810_v59 = vpop.f32.mrb[35].mxu1 }
 0x59f   : > { %2836 = vtanh.f32 %v1330_v53  ;;  %v1811_v62 = vadd.f32 %v3910_v63, %v1810_v59 }
 0x5a0   : > { %2838 = vtanh.f32 %v1819_v47 }
 0x5a1   : > { %2840 = vtanh.f32 %v1333_v25 }
 0x5a2   : > { %2842 = vtanh.f32 %v1808_v27 }
 0x5a3   : > { %v4021_v28 = vpop.f32.mrb[36].mxu1  ;;  %2844 = vtanh.f32 %v1811_v62 }
 0x5a4   : > { %v1823_v32 = vpop.f32.mrb[37].mxu1  ;;  %2846 = vtanh.f32 %v1354_v30 }
 0x5a5   : > { %v4024_v16 = vpop.f32.mrb[38].mxu1  ;;  %2848 = vtanh.f32 %v1357_v3  ;;  %v1824_v35 = vadd.f32 %v3910_v63, %v1823_v32 }
 0x5a6   : > { %v1826_v6 = vpop.f32.mrb[39].mxu1  ;;  %2850 = vtanh.f32 %v1346_v1 }
 0x5a7   : > { %v1827_v46 = vadd.f32 %v3910_v63, %v1826_v6  ;;  %2852 = vtanh.f32 %v1349_v7 }
 0x5a8   : > { %v2835_v31 = vpop.eup %2834  ;;  %2854 = vtanh.f32 %v1824_v35 }
 0x5a9   : > { %v2837_v2 = vpop.eup %2836  ;;  %v1880_v61 = vmul.f32 %v2835_v31, %v3919_v48  ;;  %2856 = vtanh.f32 %v1827_v46 }
 0x5aa   : > { %v2839_v23 = vpop.eup %2838  ;;  %v1407_v50 = vmul.f32 %v2837_v2, %v3919_v48 }
 0x5ab   : > { %1890 = vadd.xlane.f32.xlu0 %v1880_v61  ;;  %v1881_v38 = vmul.f32 %v2839_v23, %v3919_v48  ;;  %v2603_v34 = vpop.f32.mrb[32].mxu0  ;;  %v2841_v10 = vpop.eup %2840 }
 0x5ac   : > { %v1730_v45 = vpop.f32.mrb[33].mxu0  ;;  %v2843_v52 = vpop.eup %2842  ;;  %v1739_v11 = vadd.f32 %v2603_v34, %v3910_v63  ;;  %v1408_v58 = vmul.f32 %v2841_v10, %v3919_v48  ;;  %v1832_v10 = vadd.f32 %v4021_v28, %v3910_v63 }
 0x5ad   : > { %1892 = vadd.xlane.f32.xlu1 %v1881_v38  ;;  %v2604_v51 = vpop.f32.mrb[34].mxu0  ;;  %v2845_v54 = vpop.eup %2844  ;;  %v1878_v12 = vmul.f32 %v2843_v52, %v3919_v48  ;;  %v1731_v20 = vadd.f32 %v3910_v63, %v1730_v45  ;;  %v1835_v45 = vadd.f32 %v4024_v16, %v3910_v63 }
 0x5ae   : > { %v1733_v57 = vpop.f32.mrb[35].mxu0  ;;  %v2847_v13 = vpop.eup %2846  ;;  %2858 = vtanh.f32 %v1739_v11  ;;  %v1742_v56 = vadd.f32 %v2604_v51, %v3910_v63  ;;  %v1879_v14 = vmul.f32 %v2845_v54, %v3919_v48 }
 0x5af   : > { %1415 = vadd.xlane.f32.xlu0 %v1407_v50  ;;  %v2849_v53 = vpop.eup %2848  ;;  %v1734_v24 = vadd.f32 %v3910_v63, %v1733_v57  ;;  %v1413_v49 = vmul.f32 %v2847_v13, %v3919_v48 }
 0x5b0   : > { %v2851_v25 = vpop.eup %2850  ;;  %2860 = vtanh.f32 %v1742_v56  ;;  %v1414_v27 = vmul.f32 %v2849_v53, %v3919_v48  ;;  %v4066_v53 = vpop.xlane.xlu0 %1382 }
 0x5b1   : > { %1417 = vadd.xlane.f32.xlu1 %v1408_v58  ;;  %v2853_v62 = vpop.eup %2852  ;;  %2862 = vtanh.f32 %v1731_v20  ;;  %v1411_v30 = vmul.f32 %v2851_v25, %v3919_v48  ;;  %v4068_v20 = vpop.xlane.xlu1 %1384 }
 0x5b2   : > { %2864 = vtanh.f32 %v1734_v24  ;;  %v2855_v32 = vpop.eup %2854  ;;  %v1412_v31 = vmul.f32 %v2853_v62, %v3919_v48 }
 0x5b3   : > { %1886 = vadd.xlane.f32.xlu0 %v1878_v12  ;;  %v2607_v15 = vpop.f32.mrb[36].mxu0  ;;  %v2857_v6 = vpop.eup %2856  ;;  %v1882_v61 = vmul.f32 %v2855_v32, %v3919_v48 }
 0x5b4   : > { %v1746_v41 = vpop.f32.mrb[37].mxu0  ;;  %v1755_v47 = vadd.f32 %v2607_v15, %v3910_v63  ;;  %v1883_v7 = vmul.f32 %v2857_v6, %v3919_v48 }
 0x5b5   : > { %1888 = vadd.xlane.f32.xlu1 %v1879_v14  ;;  %v2608_v55 = vpop.f32.mrb[38].mxu0  ;;  %v1747_v2 = vadd.f32 %v3910_v63, %v1746_v41 }
 0x5b6   : > { %v1749_v59 = vpop.f32.mrb[39].mxu0  ;;  %2866 = vtanh.f32 %v1755_v47  ;;  %v1758_v3 = vadd.f32 %v2608_v55, %v3910_v63 }
 0x5b7   : > { %1427 = vadd.xlane.f32.xlu0 %v1413_v49  ;;  %v1750_v23 = vadd.f32 %v3910_v63, %v1749_v59 }
 0x5b8   : > { %v2859_v1 = vpop.eup %2858  ;;  %2868 = vtanh.f32 %v1758_v3 }
 0x5b9   : > { %1429 = vadd.xlane.f32.xlu1 %v1414_v27  ;;  %v1848_v38 = vmul.f32 %v2859_v1, %v3919_v48  ;;  %2870 = vtanh.f32 %v1747_v2 }
 0x5ba   : > { %v2861_v34 = vpop.eup %2860  ;;  %2872 = vtanh.f32 %v1750_v23 }
 0x5bb   : > { %1423 = vadd.xlane.f32.xlu0 %v1411_v30  ;;  %v2863_v35 = vpop.eup %2862  ;;  %v1849_v50 = vmul.f32 %v2861_v34, %v3919_v48  ;;  %2874 = vtanh.f32 %v1832_v10 }
 0x5bc   : > { %v2865_v46 = vpop.eup %2864  ;;  %v1846_v52 = vmul.f32 %v2863_v35, %v3919_v48  ;;  %2876 = vtanh.f32 %v1835_v45 }
 0x5bd   : > { %1425 = vadd.xlane.f32.xlu1 %v1412_v31  ;;  %v1847_v28 = vmul.f32 %v2865_v46, %v3919_v48 }
 0x5bf   : > { %1894 = vadd.xlane.f32.xlu0 %v1882_v61 }
 0x5c0   : > { %v2867_v51 = vpop.eup %2866 }
 0x5c1   : > { %1896 = vadd.xlane.f32.xlu1 %v1883_v7  ;;  %v1852_v11 = vmul.f32 %v2867_v51, %v3919_v48 }
 0x5c2   : > { %v2869_v57 = vpop.eup %2868 }
 0x5c3   : > { %1858 = vadd.xlane.f32.xlu0 %v1848_v38  ;;  %v2871_v63 = vpop.eup %2870  ;;  %v1853_v16 = vmul.f32 %v2869_v57, %v3919_v48 }
 0x5c4   : > { %v2873_v58 = vpop.eup %2872  ;;  %v1850_v54 = vmul.f32 %v2871_v63, %v3919_v48 }
 0x5c5   : > { %1860 = vadd.xlane.f32.xlu1 %v1849_v50  ;;  %v2875_v12 = vpop.eup %2874  ;;  %v1851_v13 = vmul.f32 %v2873_v58, %v3919_v48 }
 0x5c6   : > { %v2877_v56 = vpop.eup %2876  ;;  %v1884_v14 = vmul.f32 %v2875_v12, %v3919_v48 }
 0x5c7   : > { %1854 = vadd.xlane.f32.xlu0 %v1846_v52  ;;  %v1885_v15 = vmul.f32 %v2877_v56, %v3919_v48 }
 0x5c9   : > { %1856 = vadd.xlane.f32.xlu1 %v1847_v28 }
 0x5cb   : > { %1866 = vadd.xlane.f32.xlu0 %v1852_v11 }
 0x5cd   : > { %1868 = vadd.xlane.f32.xlu1 %v1853_v16 }
 0x5cf   : > { %1862 = vadd.xlane.f32.xlu0 %v1850_v54 }
 0x5d1   : > { %1864 = vadd.xlane.f32.xlu1 %v1851_v13 }
 0x5d3   : > { %1898 = vadd.xlane.f32.xlu0 %v1884_v14 }
 0x5d5   : > { %1900 = vadd.xlane.f32.xlu1 %v1885_v15 }
 0x5d6   : > { %3150 = shalt.err (!%p3147_p10)
}
 0x5d7   : > { %s3151_s26 = scalar_lea.hbm %s4075_s29, 2048  ;;  %s3155_s24 = scalar_lea.hbm %s4422_s13, 4096 }
 0x5d8   : > { %p3152_p5 = scmp.ne.s32.totalorder %s4075_s29, %s3151_s26  ;;  %p3156_p1 = scmp.lt.u32.totalorder %s4075_s29, %s4422_s13 }
 0x5d9   : > { %p3157_p6 = scmp.lt.u32.totalorder %s3155_s24, %s3151_s26  ;;  %p3159_p8 = scmp.lt.u32.totalorder %s3151_s26, %s4075_s29 }
 0x5da   : > { %p3153_p13 = pnand %p3152_p5, %p4423_p11 }
 0x5db   : > { %p3158_p4 = por %p3157_p6, %p3156_p1 }
 0x5dc   : > { %p3154_p3 = pneg %p3153_p13 }
 0x5dd   : > { %p3160_p0 = por %p3159_p8, %p3158_p4 }
 0x5df   : > { %p3161_p9 = pnand %p3160_p0, %p3154_p3 }
 0x5e1   : > { %3164 = shalt.err (!%p3161_p9)
}
 0x5e2   : > { %s3255_s3 = smov 128   ;;  %s3256_s6 = smov 8   ;;  %v1387_v48 = vpop.xlane.xlu0 %1386  ;;  %v1389_v41 = vpop.xlane.xlu1 %1388 }
 0x5e3   : > { %2650 = dma.vmem_to_hbm [thread:$0]  (%p4423_p11), %s4078_s28, 2048, %s4075_s29, %s2060_s30, %s3255_s3, %s3255_s3, %s3256_s6  }
 0x5e4   : > { %s970_s7 = sld [smem:[#allocation3]]  ;;  %s2073_s14 = sshll.u32 %s3573_s15, 4  ;;  %s4299_s14 = int_to_ptr.vmem [resolvable:$true] %s2073_s14 }
 0x5e5   : > { %s4424_s12 = sld [smem:[#allocation32_spill]]  ;;  %s2055_s28 = scalar_lea.sflag [#allocation6], %s3557_s4 }
 0x5e6   : > { %v4107_v24 = vpop.xlane.xlu0 %1390  ;;  %v4109_v49 = vpop.xlane.xlu1 %1392  ;;  %s3165_s30 = scalar_lea.vmem %s4299_s14, 2048  ;;  %s3257_s21 = smov [#allocation13]  }
 0x5e7   : > { %p3166_p12 = scmp.ne.s32.totalorder %s4299_s14, %s3165_s30  ;;  %s3169_s8 = sshll.u32 %s3257_s21, 4  ;;  %s3170_s8 = int_to_ptr.vmem [resolvable:$false] %s3169_s8 }
 0x5e8   : > { %s3171_s19 = scalar_lea.vmem %s3170_s8, 4096  ;;  %p3172_p10 = scmp.lt.s32.totalorder %s4299_s14, %s3170_s8 }
 0x5e9   : > { %p3167_p7 = pnand %p3166_p12, %p4423_p11  ;;  %p3173_p5 = scmp.lt.s32.totalorder %s3171_s19, %s3165_s30 }
 0x5ea   : > { %v1395_v55 = vpop.xlane.xlu0 %1394  ;;  %v4111_v25 = vstv %s970_s7  ;;  %v1397_v47 = vpop.xlane.xlu1 %1396 }
 0x5eb   : > { %v1401_v27 = vadd.f32 %v4111_v25, %v1387_v48  ;;  %v1402_v32 = vadd.f32 %v4111_v25, %v1389_v41  ;;  %v1399_v28 = vadd.f32 %v4111_v25, %v4066_v53  ;;  %v1400_v16 = vadd.f32 %v4111_v25, %v4068_v20  ;;  %s4297_s29 = scalar_lea.hbm %s4424_s12, %s2319_s17  ;;  %p3168_p2 = pneg %p3167_p7 }
 0x5ec   : > { %v1405_v20 = vadd.f32 %v4111_v25, %v1395_v55  ;;  %p3174_p13 = por %p3173_p5, %p3172_p10 }
 0x5ee   : > { %p3175_p3 = pnand %p3174_p13, %p3168_p2 }
 0x628   : > { %v1420_v59 = vpop.xlane.xlu0 %1419 }
 0x629   : > { %v1433_v62 = vadd.f32 %v1420_v59, %v4111_v25 }
 0x62a   : > { %v1422_v30 = vpop.xlane.xlu1 %1421 }
 0x62b   : > { %v1441_v3 = vmax.f32 %v1401_v27, %v1433_v62  ;;  %v1434_v6 = vadd.f32 %v1422_v30, %v4111_v25 }
 0x62d   : > { %v1449_v31 = vsub.f32 %v1401_v27, %v1441_v3  ;;  %v1473_v1 = vsub.f32 %v1433_v62, %v1441_v3  ;;  %v1442_v2 = vmax.f32 %v1402_v32, %v1434_v6 }
 0x62f   : > { %v1459_v61 = vmul.f32 1.442695, %v1449_v31  ;;  %v1483_v23 = vmul.f32 1.442695, %v1473_v1  ;;  %v1450_v7 = vsub.f32 %v1402_v32, %v1442_v2  ;;  %v1474_v38 = vsub.f32 %v1434_v6, %v1442_v2 }
 0x630   : > { %v1406_v1 = vadd.f32 %v4111_v25, %v1397_v47 }
 0x631   : > { %2878 = vpow2.f32 %v1459_v61  ;;  %v1461_v34 = vmul.f32 1.442695, %v1450_v7  ;;  %v1485_v10 = vmul.f32 1.442695, %v1474_v38 }
 0x632   : > { %2880 = vpow2.f32 %v1483_v23 }
 0x633   : > { %2882 = vpow2.f32 %v1461_v34 }
 0x634   : > { %2884 = vpow2.f32 %v1485_v10 }
 0x638   : > { %v4117_v35 = vpop.xlane.xlu0 %1890 }
 0x63a   : > { %v4119_v45 = vpop.xlane.xlu1 %1892 }
 0x63b   : > { %v2879_v46 = vpop.eup %2878 }
 0x63c   : > { %v2881_v50 = vpop.eup %2880  ;;  %v1416_v51 = vpop.xlane.xlu0 %1415 }
 0x63d   : > { %v2883_v52 = vpop.eup %2882  ;;  %v1497_v11 = vadd.f32 %v2881_v50, %v2879_v46  ;;  %v1431_v57 = vadd.f32 %v1416_v51, %v4111_v25  ;;  %v1403_v51 = vadd.f32 %v4111_v25, %v4107_v24 }
 0x63e   : > { %v2885_v63 = vpop.eup %2884  ;;  %v1418_v58 = vpop.xlane.xlu1 %1417 }
 0x63f   : > { %2886 = vrcp.f32 %v1497_v11  ;;  %v1498_v54 = vadd.f32 %v2885_v63, %v2883_v52  ;;  %v1439_v12 = vmax.f32 %v1399_v28, %v1431_v57  ;;  %v1432_v13 = vadd.f32 %v1418_v58, %v4111_v25 }
 0x640   : > { %v4127_v56 = vpop.xlane.xlu0 %1886 }
 0x641   : > { %2888 = vrcp.f32 %v1498_v54  ;;  %v1447_v14 = vsub.f32 %v1399_v28, %v1439_v12  ;;  %v1471_v15 = vsub.f32 %v1431_v57, %v1439_v12  ;;  %v1440_v48 = vmax.f32 %v1400_v16, %v1432_v13 }
 0x642   : > { %v4129_v53 = vpop.xlane.xlu1 %1888  ;;  %v1404_v28 = vadd.f32 %v4111_v25, %v4109_v49 }
 0x643   : > { %v1455_v41 = vmul.f32 1.442695, %v1447_v14  ;;  %v1479_v59 = vmul.f32 1.442695, %v1471_v15  ;;  %v1448_v27 = vsub.f32 %v1400_v16, %v1440_v48  ;;  %v1472_v62 = vsub.f32 %v1432_v13, %v1440_v48  ;;  %v2982_v14 = vld [vmem:[#allocation2 + $0x10] sm:$0xff] }
 0x644   : > { %v1428_v30 = vpop.xlane.xlu0 %1427 }
 0x645   : > { %2890 = vpow2.f32 %v1455_v41  ;;  %v1457_v32 = vmul.f32 1.442695, %v1448_v27  ;;  %v1481_v3 = vmul.f32 1.442695, %v1472_v62  ;;  %v1437_v6 = vadd.f32 %v1428_v30, %v4111_v25  ;;  %v2983_v62 = vld [vmem:[#allocation2 + $0x18] sm:$0xff] }
 0x646   : > { %2892 = vpow2.f32 %v1479_v59  ;;  %v1430_v31 = vpop.xlane.xlu1 %1429 }
 0x647   : > { %2894 = vpow2.f32 %v1457_v32  ;;  %v1445_v2 = vmax.f32 %v1405_v20, %v1437_v6  ;;  %v1438_v61 = vadd.f32 %v1430_v31, %v4111_v25 }
 0x648   : > { %2896 = vpow2.f32 %v1481_v3  ;;  %v1424_v23 = vpop.xlane.xlu0 %1423 }
 0x649   : > { %v2887_v7 = vpop.eup %2886  ;;  %v1453_v38 = vsub.f32 %v1405_v20, %v1445_v2  ;;  %v1477_v34 = vsub.f32 %v1437_v6, %v1445_v2  ;;  %v1446_v55 = vmax.f32 %v1406_v1, %v1438_v61  ;;  %v1435_v10 = vadd.f32 %v1424_v23, %v4111_v25 }
 0x64a   : > { %v1513_v11 = vmul.f32 %v2887_v7, %v2879_v46  ;;  %v1529_v47 = vmul.f32 %v2887_v7, %v2881_v50  ;;  %v1426_v57 = vpop.xlane.xlu1 %1425 }
 0x64b   : > { %v2889_v16 = vpop.eup %2888  ;;  %v1467_v58 = vmul.f32 1.442695, %v1453_v38  ;;  %v1491_v54 = vmul.f32 1.442695, %v1477_v34  ;;  %v1454_v12 = vsub.f32 %v1406_v1, %v1446_v55  ;;  %v1478_v13 = vsub.f32 %v1438_v61, %v1446_v55 }
 0x64c   : > { %v1521_v15 = vmul.f32 %v2982_v14, %v1513_v11  ;;  %v1537_v48 = vmul.f32 %v3933_v0, %v1529_v47  ;;  %v1514_v41 = vmul.f32 %v2889_v16, %v2883_v52  ;;  %v1530_v59 = vmul.f32 %v2889_v16, %v2885_v63  ;;  %v4141_v27 = vpop.xlane.xlu0 %1894 }
 0x64d   : > { %2898 = vpow2.f32 %v1467_v58  ;;  %v1469_v24 = vmul.f32 1.442695, %v1454_v12  ;;  %v1493_v49 = vmul.f32 1.442695, %v1478_v13  ;;  %v1443_v46 = vmax.f32 %v1403_v51, %v1435_v10 }
 0x64e   : > { %v1545_v50 = vadd.f32 %v1537_v48, %v1521_v15  ;;  %v1522_v20 = vmul.f32 %v2983_v62, %v1514_v41  ;;  %v1538_v30 = vmul.f32 %v3937_v18, %v1530_v59  ;;  %2900 = vpow2.f32 %v1491_v54  ;;  %v4144_v32 = vpop.xlane.xlu1 %1896 }
 0x64f   : > { %v4146_v3 = vpop.eup %2890  ;;  %2902 = vpow2.f32 %v1469_v24  ;;  %v1451_v0 = vsub.f32 %v1403_v51, %v1443_v46  ;;  %v1475_v52 = vsub.f32 %v1435_v10, %v1443_v46  ;;  %v1436_v63 = vadd.f32 %v1426_v57, %v4111_v25 }
 0x650   : > { %v4149_v6 = vpop.eup %2892  ;;  %2024 = vst [vmem:[#allocation2 + $0x10] sm:$0xff] %v1545_v50  ;;  %2040 = vst [vmem:[%s3573_s15 + $0x10] sm:$0xff] %v1545_v50  ;;  %v1546_v31 = vadd.f32 %v1538_v30, %v1522_v20  ;;  %2904 = vpow2.f32 %v1493_v49  ;;  %v1859_v1 = vpop.xlane.xlu0 %1858  ;;  %v1904_v38 = vadd.f32 %v4117_v35, %v4111_v25  ;;  %v1905_v34 = vadd.f32 %v4119_v45, %v4111_v25 }
 0x651   : > { %v4152_v2 = vpop.eup %2894  ;;  %v1495_v18 = vadd.f32 %v4149_v6, %v4146_v3  ;;  %v1463_v61 = vmul.f32 1.442695, %v1451_v0  ;;  %v1444_v23 = vmax.f32 %v1404_v28, %v1436_v63  ;;  %v1487_v55 = vmul.f32 1.442695, %v1475_v52 }
 0x652   : > { %v4156_v7 = vpop.eup %2896  ;;  %2025 = vst [vmem:[#allocation2 + $0x18] sm:$0xff] %v1546_v31  ;;  %2041 = vst [vmem:[%s3573_s15 + $0x18] sm:$0xff] %v1546_v31  ;;  %v1872_v10 = vadd.f32 %v1859_v1, %v4111_v25  ;;  %v1861_v51 = vpop.xlane.xlu1 %1860  ;;  %v1902_v16 = vadd.f32 %v4127_v56, %v4111_v25  ;;  %v1903_v56 = vadd.f32 %v4129_v53, %v4111_v25 }
 0x653   : > { %2906 = vrcp.f32 %v1495_v18  ;;  %v1496_v11 = vadd.f32 %v4156_v7, %v4152_v2  ;;  %v1452_v47 = vsub.f32 %v1404_v28, %v1444_v23  ;;  %v1476_v57 = vsub.f32 %v1436_v63, %v1444_v23 }
 0x654   : > { %2908 = vpow2.f32 %v1463_v61  ;;  %v1912_v58 = vmax.f32 %v1872_v10, %v1904_v38  ;;  %v1873_v35 = vadd.f32 %v1861_v51, %v4111_v25  ;;  %v1855_v54 = vpop.xlane.xlu0 %1854 }
 0x655   : > { %2910 = vrcp.f32 %v1496_v11  ;;  %v1465_v45 = vmul.f32 1.442695, %v1452_v47  ;;  %v1489_v12 = vmul.f32 1.442695, %v1476_v57  ;;  %v1870_v13 = vadd.f32 %v1855_v54, %v4111_v25 }
 0x656   : > { %2912 = vpow2.f32 %v1487_v55  ;;  %v1920_v14 = vsub.f32 %v1872_v10, %v1912_v58  ;;  %v1944_v15 = vsub.f32 %v1904_v38, %v1912_v58  ;;  %v1913_v48 = vmax.f32 %v1873_v35, %v1905_v34  ;;  %v1857_v41 = vpop.xlane.xlu1 %1856 }
 0x657   : > { %v4170_v28 = vpop.eup %2898  ;;  %2914 = vpow2.f32 %v1465_v45  ;;  %v1910_v59 = vmax.f32 %v1870_v13, %v1902_v16  ;;  %v1871_v24 = vadd.f32 %v1857_v41, %v4111_v25  ;;  %v1906_v38 = vadd.f32 %v4141_v27, %v4111_v25  ;;  %v2984_v41 = vld [vmem:[#allocation2] sm:$0xff] }
 0x658   : > { %v4175_v49 = vpop.eup %2900  ;;  %2916 = vpow2.f32 %v1489_v12  ;;  %v1930_v46 = vmul.f32 1.442695, %v1920_v14  ;;  %v1954_v50 = vmul.f32 1.442695, %v1944_v15  ;;  %v1921_v62 = vsub.f32 %v1873_v35, %v1913_v48  ;;  %v1867_v20 = vpop.xlane.xlu0 %1866 }
 0x659   : > { %v4177_v30 = vpop.eup %2902  ;;  %v1501_v0 = vadd.f32 %v4175_v49, %v4170_v28  ;;  %v1945_v52 = vsub.f32 %v1905_v34, %v1913_v48  ;;  %v1918_v63 = vsub.f32 %v1870_v13, %v1910_v59  ;;  %v1942_v31 = vsub.f32 %v1902_v16, %v1910_v59 }
 0x65a   : > { %v4181_v53 = vpop.eup %2904  ;;  %2918 = vpow2.f32 %v1930_v46  ;;  %v1932_v1 = vmul.f32 1.442695, %v1921_v62  ;;  %v1911_v18 = vmax.f32 %v1871_v24, %v1903_v56  ;;  %v1869_v61 = vpop.xlane.xlu1 %1868  ;;  %v4189_v10 = vadd.f32 %v4144_v32, %v4111_v25 }
 0x65b   : > { %2920 = vrcp.f32 %v1501_v0  ;;  %v1502_v23 = vadd.f32 %v4181_v53, %v4177_v30  ;;  %v1956_v55 = vmul.f32 1.442695, %v1945_v52  ;;  %v1926_v57 = vmul.f32 1.442695, %v1918_v63 }
 0x65c   : > { %2922 = vpow2.f32 %v1954_v50  ;;  %v1919_v34 = vsub.f32 %v1871_v24, %v1911_v18  ;;  %v1943_v51 = vsub.f32 %v1903_v56, %v1911_v18  ;;  %v1863_v11 = vpop.xlane.xlu0 %1862  ;;  %v1950_v16 = vmul.f32 1.442695, %v1942_v31  ;;  %v2985_v31 = vld [vmem:[#allocation2 + $0x8] sm:$0xff] }
 0x65d   : > { %v2907_v47 = vpop.eup %2906  ;;  %2924 = vrcp.f32 %v1502_v23  ;;  %v1874_v58 = vadd.f32 %v1863_v11, %v4111_v25  ;;  %v1876_v18 = vadd.f32 %v1867_v20, %v4111_v25  ;;  %v1877_v11 = vadd.f32 %v1869_v61, %v4111_v25 }
 0x65e   : > { %v4192_v35 = vpop.eup %2908  ;;  %v1511_v54 = vmul.f32 %v2907_v47, %v4146_v3  ;;  %v1527_v27 = vmul.f32 %v2907_v47, %v4149_v6  ;;  %2926 = vpow2.f32 %v1932_v1  ;;  %v1928_v45 = vmul.f32 1.442695, %v1919_v34  ;;  %v1865_v32 = vpop.xlane.xlu1 %1864 }
 0x65f   : > { %v2911_v12 = vpop.eup %2910  ;;  %2928 = vpow2.f32 %v1956_v55  ;;  %v1952_v13 = vmul.f32 1.442695, %v1943_v51  ;;  %v1914_v14 = vmax.f32 %v1874_v58, %v1906_v38  ;;  %v1875_v15 = vadd.f32 %v1865_v32, %v4111_v25 }
 0x660   : > { %v4197_v48 = vpop.eup %2912  ;;  %v1519_v56 = vmul.f32 %v2984_v41, %v1511_v54  ;;  %v1535_v59 = vmul.f32 %v1527_v27, %v3935_v60  ;;  %v1512_v24 = vmul.f32 %v2911_v12, %v4152_v2  ;;  %v1528_v3 = vmul.f32 %v2911_v12, %v4156_v7  ;;  %v1899_v0 = vpop.xlane.xlu0 %1898  ;;  %v2986_v12 = vld [vmem:[#allocation2 + $0x30] sm:$0xff] }
 0x661   : > { %v4202_v6 = vpop.eup %2914  ;;  %v1499_v46 = vadd.f32 %v4197_v48, %v4192_v35  ;;  %2930 = vpow2.f32 %v1926_v57  ;;  %v1922_v50 = vsub.f32 %v1874_v58, %v1914_v14  ;;  %v1946_v62 = vsub.f32 %v1906_v38, %v1914_v14 }
 0x662   : > { %v4206_v52 = vpop.eup %2916  ;;  %v1543_v63 = vadd.f32 %v1535_v59, %v1519_v56  ;;  %v1520_v1 = vmul.f32 %v2985_v31, %v1512_v24  ;;  %v1536_v60 = vmul.f32 %v1528_v3, %v3941_v33  ;;  %2932 = vpow2.f32 %v1950_v16  ;;  %v1901_v2 = vpop.xlane.xlu1 %1900 }
 0x663   : > { %2934 = vrcp.f32 %v1499_v46  ;;  %v1500_v7 = vadd.f32 %v4206_v52, %v4202_v6  ;;  %v1934_v23 = vmul.f32 1.442695, %v1922_v50  ;;  %v1915_v34 = vmax.f32 %v1875_v15, %v4189_v10 }
 0x664   : > { %v4212_v55 = vpop.eup %2918  ;;  %2022 = vst [vmem:[#allocation2] sm:$0xff] %v1543_v63  ;;  %2038 = vst [vmem:[%s3573_s15] sm:$0xff] %v1543_v63  ;;  %v1544_v38 = vadd.f32 %v1536_v60, %v1520_v1  ;;  %2936 = vpow2.f32 %v1928_v45  ;;  %v1908_v33 = vadd.f32 %v1899_v0, %v4111_v25  ;;  %v1958_v47 = vmul.f32 1.442695, %v1946_v62 }
 0x665   : > { %v2921_v51 = vpop.eup %2920  ;;  %2938 = vrcp.f32 %v1500_v7  ;;  %v4219_v57 = vadd.f32 %v1901_v2, %v4111_v25  ;;  %v1923_v54 = vsub.f32 %v1875_v15, %v1915_v34  ;;  %v1947_v61 = vsub.f32 %v4189_v10, %v1915_v34  ;;  %v2987_v10 = vld [vmem:[#allocation2 + $0x38] sm:$0xff] }
 0x666   : > { %v4221_v20 = vpop.eup %2922  ;;  %2023 = vst [vmem:[#allocation2 + $0x8] sm:$0xff] %v1544_v38  ;;  %2039 = vst [vmem:[%s3573_s15 + $0x8] sm:$0xff] %v1544_v38  ;;  %v1517_v16 = vmul.f32 %v2921_v51, %v4170_v28  ;;  %v1533_v58 = vmul.f32 %v2921_v51, %v4175_v49  ;;  %2940 = vpow2.f32 %v1952_v13  ;;  %v1916_v32 = vmax.f32 %v1876_v18, %v1908_v33  ;;  %v2988_v51 = vld [vmem:[#allocation2 + $0x20] sm:$0xff] }
 0x667   : > { %v2925_v27 = vpop.eup %2924  ;;  %v1968_v45 = vadd.f32 %v4221_v20, %v4212_v55  ;;  %2942 = vpow2.f32 %v1934_v23  ;;  %v1936_v15 = vmul.f32 1.442695, %v1923_v54  ;;  %v1960_v56 = vmul.f32 1.442695, %v1947_v61 }
 0x668   : > { %v4229_v25 = vpop.eup %2926  ;;  %v1525_v14 = vmul.f32 %v2986_v12, %v1517_v16  ;;  %v1541_v41 = vmul.f32 %v3945_v22, %v1533_v58  ;;  %v1518_v28 = vmul.f32 %v2925_v27, %v4177_v30  ;;  %v1534_v49 = vmul.f32 %v2925_v27, %v4181_v53  ;;  %v2989_v27 = vld [vmem:[#allocation2 + $0x28] sm:$0xff] }
 0x669   : > { %v4234_v13 = vpop.eup %2928  ;;  %2944 = vrcp.f32 %v1968_v45  ;;  %v1924_v59 = vsub.f32 %v1876_v18, %v1916_v32  ;;  %v1948_v30 = vsub.f32 %v1908_v33, %v1916_v32  ;;  %v1917_v53 = vmax.f32 %v1877_v11, %v4219_v57 }
 0x66a   : > { %v1549_v24 = vadd.f32 %v1541_v41, %v1525_v14  ;;  %v1526_v3 = vmul.f32 %v2987_v10, %v1518_v28  ;;  %v1542_v46 = vmul.f32 %v3951_v29, %v1534_v49  ;;  %v1969_v50 = vadd.f32 %v4234_v13, %v4229_v25 }
 0x66b   : > { %v4239_v22 = vpop.eup %2930  ;;  %2946 = vpow2.f32 %v1958_v47  ;;  %v1938_v63 = vmul.f32 1.442695, %v1924_v59  ;;  %v1962_v1 = vmul.f32 1.442695, %v1948_v30  ;;  %v1925_v60 = vsub.f32 %v1877_v11, %v1917_v53 }
 0x66c   : > { %v4242_v62 = vpop.eup %2932  ;;  %2028 = vst [vmem:[#allocation2 + $0x30] sm:$0xff] %v1549_v24  ;;  %2044 = vst [vmem:[%s3573_s15 + $0x30] sm:$0xff] %v1549_v24  ;;  %v1550_v0 = vadd.f32 %v1542_v46, %v1526_v3  ;;  %2948 = vrcp.f32 %v1969_v50  ;;  %v1949_v23 = vsub.f32 %v4219_v57, %v1917_v53 }
 0x66d   : > { %v2935_v31 = vpop.eup %2934  ;;  %v1966_v29 = vadd.f32 %v4242_v62, %v4239_v22  ;;  %2950 = vpow2.f32 %v1936_v15  ;;  %v1940_v34 = vmul.f32 1.442695, %v1925_v60 }
 0x66e   : > { %v4247_v2 = vpop.eup %2936  ;;  %2029 = vst [vmem:[#allocation2 + $0x38] sm:$0xff] %v1550_v0  ;;  %2045 = vst [vmem:[%s3573_s15 + $0x38] sm:$0xff] %v1550_v0  ;;  %v1515_v7 = vmul.f32 %v2935_v31, %v4192_v35  ;;  %v1531_v18 = vmul.f32 %v2935_v31, %v4197_v48  ;;  %2952 = vpow2.f32 %v1960_v56  ;;  %v1964_v48 = vmul.f32 1.442695, %v1949_v23  ;;  %v2990_v31 = vld [vmem:[#allocation2 + $0x48] sm:$0xff] }
 0x66f   : > { %v2939_v38 = vpop.eup %2938  ;;  %2954 = vrcp.f32 %v1966_v29 }
 0x670   : > { %v2941_v33 = vpop.eup %2940  ;;  %v1523_v47 = vmul.f32 %v2988_v51, %v1515_v7  ;;  %v1539_v11 = vmul.f32 %v1531_v18, %v3948_v19  ;;  %v1516_v16 = vmul.f32 %v2939_v38, %v4202_v6  ;;  %v1532_v58 = vmul.f32 %v2939_v38, %v4206_v52 }
 0x671   : > { %v4256_v54 = vpop.eup %2942  ;;  %v1967_v35 = vadd.f32 %v2941_v33, %v4247_v2  ;;  %2956 = vpow2.f32 %v1938_v63 }
 0x672   : > { %v1547_v57 = vadd.f32 %v1539_v11, %v1523_v47  ;;  %v1524_v45 = vmul.f32 %v2989_v27, %v1516_v16  ;;  %v1540_v61 = vmul.f32 %v1532_v58, %v3955_v37  ;;  %2958 = vpow2.f32 %v1962_v1  ;;  %v2992_v27 = vld [vmem:[#allocation2 + $0x78] sm:$0xff] }
 0x673   : > { %v2945_v32 = vpop.eup %2944  ;;  %2960 = vrcp.f32 %v1967_v35 }
 0x674   : > { %2026 = vst [vmem:[#allocation2 + $0x20] sm:$0xff] %v1547_v57  ;;  %2042 = vst [vmem:[%s3573_s15 + $0x20] sm:$0xff] %v1547_v57  ;;  %v1548_v19 = vadd.f32 %v1540_v61, %v1524_v45  ;;  %v1984_v6 = vmul.f32 %v2945_v32, %v4212_v55  ;;  %v2000_v52 = vmul.f32 %v2945_v32, %v4221_v20  ;;  %2962 = vpow2.f32 %v1940_v34 }
 0x675   : > { %v2947_v12 = vpop.eup %2946  ;;  %2964 = vpow2.f32 %v1964_v48 }
 0x676   : > { %v2949_v14 = vpop.eup %2948  ;;  %2027 = vst [vmem:[#allocation2 + $0x28] sm:$0xff] %v1548_v19  ;;  %2043 = vst [vmem:[%s3573_s15 + $0x28] sm:$0xff] %v1548_v19  ;;  %v1992_v41 = vmul.f32 %v3998_v8, %v1984_v6  ;;  %v2008_v37 = vmul.f32 %v3964_v17, %v2000_v52  ;;  %v1970_v28 = vadd.f32 %v2947_v12, %v4256_v54 }
 0x677   : > { %v2951_v49 = vpop.eup %2950  ;;  %v1985_v15 = vmul.f32 %v2949_v14, %v4229_v25  ;;  %v2001_v55 = vmul.f32 %v2949_v14, %v4234_v13 }
 0x678   : > { %v2953_v56 = vpop.eup %2952  ;;  %v2016_v20 = vadd.f32 %v2008_v37, %v1992_v41  ;;  %2966 = vrcp.f32 %v1970_v28 }
 0x679   : > { %v2955_v59 = vpop.eup %2954  ;;  %v1993_v24 = vmul.f32 %v4000_v4, %v1985_v15  ;;  %v2009_v10 = vmul.f32 %v3970_v42, %v2001_v55  ;;  %v1971_v3 = vadd.f32 %v2953_v56, %v2951_v49 }
 0x67a   : > { %2032 = vst [vmem:[#allocation2 + $0x50] sm:$0xff] %v2016_v20  ;;  %2048 = vst [vmem:[%s3573_s15 + $0x50] sm:$0xff] %v2016_v20  ;;  %v1982_v17 = vmul.f32 %v2955_v59, %v4239_v22  ;;  %v1998_v8 = vmul.f32 %v2955_v59, %v4242_v62 }
 0x67b   : > { %v2957_v46 = vpop.eup %2956  ;;  %v2017_v25 = vadd.f32 %v2009_v10, %v1993_v24  ;;  %2968 = vrcp.f32 %v1971_v3 }
 0x67c   : > { %v2959_v13 = vpop.eup %2958  ;;  %v1990_v50 = vmul.f32 %v3960_v39, %v1982_v17  ;;  %v2006_v30 = vmul.f32 %v1998_v8, %v3967_v40 }
 0x67d   : > { %v2961_v53 = vpop.eup %2960  ;;  %2033 = vst [vmem:[#allocation2 + $0x58] sm:$0xff] %v2017_v25  ;;  %2049 = vst [vmem:[%s3573_s15 + $0x58] sm:$0xff] %v2017_v25  ;;  %v1972_v42 = vadd.f32 %v2959_v13, %v2957_v46 }
 0x67e   : > { %v2963_v4 = vpop.eup %2962  ;;  %v2014_v0 = vadd.f32 %v2006_v30, %v1990_v50  ;;  %v1983_v63 = vmul.f32 %v2961_v53, %v4247_v2  ;;  %v1999_v22 = vmul.f32 %v2961_v53, %v2941_v33 }
 0x67f   : > { %v2965_v62 = vpop.eup %2964  ;;  %2970 = vrcp.f32 %v1972_v42 }
 0x680   : > { %2030 = vst [vmem:[#allocation2 + $0x40] sm:$0xff] %v2014_v0  ;;  %2046 = vst [vmem:[%s3573_s15 + $0x40] sm:$0xff] %v2014_v0  ;;  %v1991_v29 = vmul.f32 %v2990_v31, %v1983_v63  ;;  %v2007_v39 = vmul.f32 %v1999_v22, %v3974_v21  ;;  %v1973_v1 = vadd.f32 %v2965_v62, %v2963_v4 }
 0x682   : > { %v2967_v40 = vpop.eup %2966  ;;  %v2015_v60 = vadd.f32 %v2007_v39, %v1991_v29  ;;  %2972 = vrcp.f32 %v1973_v1 }
 0x683   : > { %v1986_v7 = vmul.f32 %v2967_v40, %v4256_v54  ;;  %v2002_v18 = vmul.f32 %v2967_v40, %v2947_v12 }
 0x684   : > { %2031 = vst [vmem:[#allocation2 + $0x48] sm:$0xff] %v2015_v60  ;;  %2047 = vst [vmem:[%s3573_s15 + $0x48] sm:$0xff] %v2015_v60 }
 0x685   : > { %v2969_v2 = vpop.eup %2968  ;;  %v1994_v23 = vmul.f32 %v4005_v26, %v1986_v7  ;;  %v2010_v38 = vmul.f32 %v2002_v18, %v3983_v43  ;;  %v2991_v43 = vld [vmem:[#allocation2 + $0x70] sm:$0xff] }
 0x686   : > { %v1987_v34 = vmul.f32 %v2969_v2, %v2951_v49  ;;  %v2003_v33 = vmul.f32 %v2969_v2, %v2953_v56 }
 0x687   : > { %v2018_v51 = vadd.f32 %v2010_v38, %v1994_v23 }
 0x688   : > { %v1995_v21 = vmul.f32 %v4007_v9, %v1987_v34  ;;  %v2011_v47 = vmul.f32 %v2003_v33, %v3990_v36 }
 0x689   : > { %v2971_v11 = vpop.eup %2970  ;;  %2034 = vst [vmem:[#allocation2 + $0x60] sm:$0xff] %v2018_v51  ;;  %2050 = vst [vmem:[%s3573_s15 + $0x60] sm:$0xff] %v2018_v51 }
 0x68a   : > { %v2019_v16 = vadd.f32 %v2011_v47, %v1995_v21  ;;  %v1988_v58 = vmul.f32 %v2971_v11, %v2957_v46  ;;  %v2004_v54 = vmul.f32 %v2971_v11, %v2959_v13 }
 0x68c   : > { %v2973_v35 = vpop.eup %2972  ;;  %2035 = vst [vmem:[#allocation2 + $0x68] sm:$0xff] %v2019_v16  ;;  %2051 = vst [vmem:[%s3573_s15 + $0x68] sm:$0xff] %v2019_v16  ;;  %v1996_v26 = vmul.f32 %v2991_v43, %v1988_v58  ;;  %v2012_v9 = vmul.f32 %v3980_v5, %v2004_v54 }
 0x68d   : > { %v1989_v48 = vmul.f32 %v2973_v35, %v2963_v4  ;;  %v2005_v36 = vmul.f32 %v2973_v35, %v2965_v62 }
 0x68e   : > { %v2020_v57 = vadd.f32 %v2012_v9, %v1996_v26 }
 0x68f   : > { %v1997_v45 = vmul.f32 %v2992_v27, %v1989_v48  ;;  %v2013_v61 = vmul.f32 %v3986_v44, %v2005_v36 }
 0x690   : > { %2036 = vst [vmem:[#allocation2 + $0x70] sm:$0xff] %v2020_v57  ;;  %2052 = vst [vmem:[%s3573_s15 + $0x70] sm:$0xff] %v2020_v57 }
 0x691   : > { %v2021_v32 = vadd.f32 %v2013_v61, %v1997_v45 }
 0x693   : > { %2037 = vst [vmem:[#allocation2 + $0x78] sm:$0xff] %v2021_v32  ;;  %2053 = vst [vmem:[%s3573_s15 + $0x78] sm:$0xff] %v2021_v32 }
 0x694   : > { %3178 = shalt.err (!%p3175_p3)
}
 0x695   : > { %s3179_s15 = scalar_lea.hbm %s4297_s29, 2048  ;;  %s3183_s22 = scalar_lea.hbm %s4424_s12, 4096 }
 0x696   : > { %p3180_p1 = scmp.ne.s32.totalorder %s4297_s29, %s3179_s15  ;;  %p3184_p8 = scmp.lt.u32.totalorder %s4297_s29, %s4424_s12 }
 0x697   : > { %p3185_p0 = scmp.lt.u32.totalorder %s3183_s22, %s3179_s15  ;;  %p3187_p12 = scmp.lt.u32.totalorder %s3179_s15, %s4297_s29 }
 0x698   : > { %p3181_p6 = pnand %p3180_p1, %p4423_p11 }
 0x699   : > { %p3186_p9 = por %p3185_p0, %p3184_p8 }
 0x69a   : > { %p3182_p4 = pneg %p3181_p6 }
 0x69b   : > { %p3188_p7 = por %p3187_p12, %p3186_p9 }
 0x69d   : > { %p3189_p2 = pnand %p3188_p7, %p3182_p4 }
 0x69f   : > { %3192 = shalt.err (!%p3189_p2)
}
 0x6a0   : > { %2649 = dma.vmem_to_hbm [thread:$0]  (%p4423_p11), %s4299_s14, 2048, %s4297_s29, %s2055_s28, %s3255_s3, %s3255_s3, %s3256_s6  }
 0x6a1 PF: > { %s4425_s20 = sld [smem:[#allocation21_spill]]  ;;  %s4426_s24 = sld [smem:[#allocation23_spill]] }
 0x6a2   : > { %p4428_p5 = scmp.ge.s32.totalorder %s3243_s18, 2 }
 0x6a7   : > { %s2104_s27 = sand.u32 1, %s4425_s20   ;;  %p4427_p10 = scmp.ne.s32.totalorder %s4426_s24, 0 }
 0x6a8   : > { %s2105_s9 = scalar_lea.sflag [#allocation6], %s2104_s27 }
 0x6a9   : > { %p2671_p13 = pnand %p4428_p5, %p4427_p10 }
 0x6ab   : > { %3222 = dma.done.wait (!%p2671_p13), %s2105_s9, 2048  }
 0x6ac   : > { %3224 = vsyncadd (!%p2671_p13), %s2105_s9, 4294965248  ;;  %s2114_s10 = scalar_lea.sflag [#allocation15], %s2104_s27 }
 0x6ad   : > { %3226 = dma.done.wait (!%p2671_p13), %s2114_s10, 2048  }
 0x6ae   : > { %3228 = vsyncadd (!%p2671_p13), %s2114_s10, 4294965248  ;;  %s4429_s18 = sld [smem:[#allocation24_spill]]  ;;  %s4430_s4 = sld [smem:[#allocation22_spill]] }
 0x6af   : > { %s4431_s17 = sld [smem:[#allocation25_spill]]  ;;  %s4432_s15 = smov %s3235_s16 }
 0x6b4   : > { %p30_p11 = scmp.ge.s32.totalorder %s4429_s18, 4   ;;  %s4433_s16 = smov %s4430_s4 }
 0x6b6   :  { %32 = sbr.rel (!%p30_p11) target bundleno = 18 (0x12), region = 146 }
 0x6bd   :  { %2119 = vsyncpa [#allocation5], 1 }
 0x6be   :  { %2121 = vsyncpa [#allocation5 + $0x1], 1 }
 0x6bf   :  { %2122 = vsyncpa [#allocation8], 1 }
 0x6c0   :  { %2124 = vsyncpa [#allocation8 + $0x1], 1 }
 0x6c1   :  { %2125 = vsyncpa [#allocation11], 1 }
 0x6c2   :  { %2126 = vsyncpa [#allocation6], 1 }
 0x6c3   :  { %2128 = vsyncpa [#allocation6 + $0x1], 1 }
 0x6c4   :  { %2129 = vsyncpa [#allocation15], 1 }
 0x6c5   :  { %2131 = vsyncpa [#allocation15 + $0x1], 1 }

</bundles_post_ra>
